<compile_context>
chip_gen: v7x
topology: tpu7x:2x2x1
jax: 0.10.0
libtpu: 0.0.40
codegen_flags: <defaults>
</compile_context>

<pallas_src>
import functools
import math

import jax
import jax.numpy as jnp
from jax import lax
from jax.experimental import pallas as pl
from jax.experimental.pallas import tpu as pltpu


# ----------------------------- in-kernel helpers -----------------------------

def _layer_norm(x, gamma, beta, eps):
    # x: (R, E) f32; gamma/beta: (1, E). Matches torch.nn.LayerNorm (biased var).
    mu = jnp.mean(x, axis=-1, keepdims=True)
    var = jnp.mean(jnp.square(x - mu), axis=-1, keepdims=True)
    return (x - mu) * lax.rsqrt(var + eps) * gamma + beta


def _erf_approx(x):
    # Abramowitz & Stegun 7.1.26, max abs error ~1.5e-7 (VPU/EUP ops only).
    a1, a2, a3, a4, a5 = 0.254829592, -0.284496736, 1.421413741, -1.453152027, 1.061405429
    p = 0.3275911
    ax = jnp.abs(x)
    t = 1.0 / (1.0 + p * ax)
    poly = ((((a5 * t + a4) * t + a3) * t + a2) * t + a1) * t
    y = 1.0 - poly * jnp.exp(-ax * ax)
    return jnp.where(x >= 0, y, -y)


def _gelu_exact(x):
    # nn.GELU() default (erf form).
    return 0.5 * x * (1.0 + _erf_approx(x * (1.0 / math.sqrt(2.0))))


# --------------------------------- kernels -----------------------------------

def encoder_layer_kernel(x_ref, wqkv_ref, bqkv_ref, wo_ref, bo_ref,
                         g1_ref, be1_ref, g2_ref, be2_ref,
                         w1_ref, b1_ref, w2_ref, b2_ref,
                         out_ref, ctx_ref,
                         *, head_num, head_dim, eps):
    # x_ref/out_ref: (S, E) — one batch element.  Weights are pre-transposed to
    # (in, out) layout and bf16 in the wrapper; ctx_ref is an (S, E) f32 scratch.
    E = head_num * head_dim
    bf = jnp.bfloat16
    x = x_ref[...].astype(jnp.float32)

    # ---- LayerNorm 1 ----
    xn = _layer_norm(x, g1_ref[...], be1_ref[...], eps)

    # ---- fused Q/K/V projection: one (S,E)@(E,3E) bf16 matmul, f32 acc ----
    qkv = jnp.dot(xn.astype(bf), wqkv_ref[...],
                  preferred_element_type=jnp.float32) + bqkv_ref[...]

    scale = 1.0 / math.sqrt(head_dim)
    q = (qkv[:, 0:E] * scale).astype(bf)          # fold 1/sqrt(dh) into q once
    k = qkv[:, E:2 * E].astype(bf)
    v = qkv[:, 2 * E:3 * E].astype(bf)

    # ---- Multi-head attention.  Each head's context is written into its
    #      column slice of the (S, E) scratch; one full-width o-projection
    #      (contraction K=E fills the MXU) happens after the loop. ----
    for h in range(head_num):
        lo = h * head_dim
        qh = q[:, lo:lo + head_dim]
        kh = k[:, lo:lo + head_dim]
        vh = v[:, lo:lo + head_dim]
        # q @ k^T via rhs-last-dim contraction (no explicit XLU transpose).
        s = lax.dot_general(qh, kh, (((1,), (1,)), ((), ())),
                            preferred_element_type=jnp.float32)        # (S, S)
        s = s - jnp.max(s, axis=-1, keepdims=True)
        p = jnp.exp(s)
        inv = pl.reciprocal(jnp.sum(p, axis=-1, keepdims=True), approx=True)
        p = p * inv                                                    # softmax
        ctx = jnp.dot(p.astype(bf), vh,
                      preferred_element_type=jnp.float32)              # (S, dh)
        ctx_ref[:, lo:lo + head_dim] = ctx

    attn = jnp.dot(ctx_ref[...].astype(bf), wo_ref[...],
                   preferred_element_type=jnp.float32) + bo_ref[...]   # (S, E)

    # residual 1 (attention dropout / dropout are identity in eval mode)
    x1 = x + attn

    # ---- LayerNorm 2 + MLP ----
    yn = _layer_norm(x1, g2_ref[...], be2_ref[...], eps)
    h1 = jnp.dot(yn.astype(bf), w1_ref[...],
                 preferred_element_type=jnp.float32) + b1_ref[...]
    h1 = _gelu_exact(h1)
    y = jnp.dot(h1.astype(bf), w2_ref[...],
                preferred_element_type=jnp.float32) + b2_ref[...]

    # residual 2
    out_ref[...] = (x1 + y).astype(out_ref.dtype)


def layernorm_kernel(x_ref, g_ref, b_ref, out_ref, *, eps):
    x = x_ref[...].astype(jnp.float32)
    out_ref[...] = _layer_norm(x, g_ref[...], b_ref[...], eps).astype(out_ref.dtype)


# -------------------------------- wrappers -----------------------------------

def _encoder_layer_call(x, p, head_num, eps, single_buffer_weights):
    B, S, E = x.shape
    mlp_dim = p["w1"].shape[0]
    head_dim = E // head_num
    bf = jnp.bfloat16

    # nn.Linear stores W as (out, in); pre-transpose + fuse QKV + cast to bf16
    # once in the wrapper so the kernel never transposes/casts weights.
    wqkv = jnp.concatenate([p["wq"].T, p["wk"].T, p["wv"].T], axis=1).astype(bf)  # (E, 3E)
    bqkv = jnp.concatenate([p["bq"], p["bk"], p["bv"]]).reshape(1, 3 * E).astype(jnp.float32)
    wo_t = p["wo"].T.astype(bf)
    w1_t = p["w1"].T.astype(bf)
    w2_t = p["w2"].T.astype(bf)
    row = lambda a: a.reshape(1, -1).astype(jnp.float32)

    def const_spec(shape):
        imap = lambda b, _n=len(shape): (0,) * _n
        if single_buffer_weights:
            # Constant index_map -> double buffering buys nothing; single-buffer
            # to halve weight VMEM (critical on v7x's 64 MiB VMEM at ViT-B scale).
            return pl.BlockSpec(shape, imap, pipeline_mode=pl.Buffered(1))
        return pl.BlockSpec(shape, imap)

    # VMEM budget: single-buffered bf16 weights + double-buffered (S,E) in/out
    # activations + scratch + generous slack for matmul intermediates.
    weight_bytes = 2 * (E * 3 * E + E * E + 2 * E * mlp_dim)
    act_bytes = 4 * S * (4 * E            # double-buffered in + out blocks
                         + E              # ctx scratch
                         + 3 * E + mlp_dim + 4 * E)   # qkv / mlp intermediates
    vmem_limit = int(min(max(2 * (weight_bytes + act_bytes), 16 * 2**20), 48 * 2**20))

    kernel = functools.partial(encoder_layer_kernel, head_num=head_num,
                               head_dim=head_dim, eps=eps)

    return pl.pallas_call(
        kernel,
        out_shape=jax.ShapeDtypeStruct((B, S, E), x.dtype),
        grid_spec=pltpu.PrefetchScalarGridSpec(
            num_scalar_prefetch=0,
            grid=(B,),
            in_specs=[
                pl.BlockSpec((None, S, E), lambda b: (b, 0, 0)),   # x, one batch row
                const_spec((E, 3 * E)), const_spec((1, 3 * E)),    # Wqkv^T, bqkv
                const_spec((E, E)), const_spec((1, E)),            # Wo^T, bo
                const_spec((1, E)), const_spec((1, E)),            # LN1 gamma, beta
                const_spec((1, E)), const_spec((1, E)),            # LN2 gamma, beta
                const_spec((E, mlp_dim)), const_spec((1, mlp_dim)),# W1^T, b1
                const_spec((mlp_dim, E)), const_spec((1, E)),      # W2^T, b2
            ],
            out_specs=pl.BlockSpec((None, S, E), lambda b: (b, 0, 0)),
            scratch_shapes=[pltpu.VMEM((S, E), jnp.float32)],      # per-head ctx
        ),
        compiler_params=pltpu.CompilerParams(
            dimension_semantics=("parallel",),
            vmem_limit_bytes=vmem_limit),
    )(x, wqkv, bqkv, wo_t, row(p["bo"]),
      row(p["ln1_g"]), row(p["ln1_b"]), row(p["ln2_g"]), row(p["ln2_b"]),
      w1_t, row(p["b1"]), w2_t, row(p["b2"]))


def encoder_layer(x, p, head_num, eps=1e-5):
    """x: (B, S, E). p: dict of PyTorch-layout params for one EncoderLayer."""
    try:
        return _encoder_layer_call(x, p, head_num, eps, single_buffer_weights=True)
    except Exception:
        # Fallback if this jax build rejects pipeline_mode=pl.Buffered(1).
        return _encoder_layer_call(x, p, head_num, eps, single_buffer_weights=False)


def final_layernorm(x, g, b, eps=1e-5):
    """Final LayerNorm: fold batch*seq into an aligned M dimension."""
    B, S, E = x.shape
    rows = B * S
    xf = x.reshape(rows, E)
    tm = rows
    for cand in (2048, 1024, 512, 256, 128, 64, 32, 16, 8):   # mem-bound: big tiles
        if rows % cand == 0:
            tm = cand
            break
    out = pl.pallas_call(
        functools.partial(layernorm_kernel, eps=eps),
        out_shape=jax.ShapeDtypeStruct((rows, E), x.dtype),
        grid_spec=pltpu.PrefetchScalarGridSpec(
            num_scalar_prefetch=0,
            grid=(rows // tm,),
            in_specs=[
                pl.BlockSpec((tm, E), lambda i: (i, 0)),
                pl.BlockSpec((1, E), lambda i: (0, 0)),
                pl.BlockSpec((1, E), lambda i: (0, 0)),
            ],
            out_specs=pl.BlockSpec((tm, E), lambda i: (i, 0)),
        ),
        compiler_params=pltpu.CompilerParams(
            dimension_semantics=("parallel",)),
    )(xf, g.reshape(1, E), b.reshape(1, E))
    return out.reshape(B, S, E)


def encoder_forward(x, params, head_num, eps=1e-5):
    for lp in params["layers"]:
        x = encoder_layer(x, lp, head_num, eps)
    return final_layernorm(x, params["ln_g"], params["ln_b"], eps)


# --------------------------- params & pure-JAX ref ----------------------------

def init_params(key, embed_dim, mlp_dim, num_layers, scale=0.1):
    def nrm(k, shape):
        return scale * jax.random.normal(k, shape, jnp.float32)

    layers = []
    for _ in range(num_layers):
        key, *ks = jax.random.split(key, 17)
        ks = iter(ks)
        layers.append(dict(
            wq=nrm(next(ks), (embed_dim, embed_dim)), bq=nrm(next(ks), (embed_dim,)),
            wk=nrm(next(ks), (embed_dim, embed_dim)), bk=nrm(next(ks), (embed_dim,)),
            wv=nrm(next(ks), (embed_dim, embed_dim)), bv=nrm(next(ks), (embed_dim,)),
            wo=nrm(next(ks), (embed_dim, embed_dim)), bo=nrm(next(ks), (embed_dim,)),
            ln1_g=1.0 + nrm(next(ks), (embed_dim,)), ln1_b=nrm(next(ks), (embed_dim,)),
            ln2_g=1.0 + nrm(next(ks), (embed_dim,)), ln2_b=nrm(next(ks), (embed_dim,)),
            w1=nrm(next(ks), (mlp_dim, embed_dim)), b1=nrm(next(ks), (mlp_dim,)),
            w2=nrm(next(ks), (embed_dim, mlp_dim)), b2=nrm(next(ks), (embed_dim,)),
        ))
    key, kg, kb = jax.random.split(key, 3)
    return dict(layers=layers,
                ln_g=1.0 + nrm(kg, (embed_dim,)),
                ln_b=nrm(kb, (embed_dim,)))


def reference(x, params, head_num, eps=1e-5):
    """Pure-JAX replica of the PyTorch Encoder forward (eval mode), using the
    same mixed precision as the kernel (bf16 matmul operands, f32 accumulate)."""
    bf, f32 = jnp.bfloat16, jnp.float32

    def ln(z, g, b):
        mu = z.mean(-1, keepdims=True)
        var = jnp.square(z - mu).mean(-1, keepdims=True)
        return (z - mu) / jnp.sqrt(var + eps) * g + b

    def mm(a, w):  # nn.Linear (no bias): a @ W^T, bf16 operands, f32 accumulate
        return jnp.dot(a.astype(bf), w.T.astype(bf), preferred_element_type=f32)

    B, S, E = x.shape
    dh = E // head_num
    scale = 1.0 / math.sqrt(dh)
    for p in params["layers"]:
        xn = ln(x, p["ln1_g"], p["ln1_b"])
        q = mm(xn, p["wq"]) + p["bq"]
        k = mm(xn, p["wk"]) + p["bk"]
        v = mm(xn, p["wv"]) + p["bv"]
        qh = (q * scale).reshape(B, S, head_num, dh).transpose(0, 2, 1, 3).astype(bf)
        kh = k.reshape(B, S, head_num, dh).transpose(0, 2, 1, 3).astype(bf)
        vh = v.reshape(B, S, head_num, dh).transpose(0, 2, 1, 3).astype(bf)
        att = jnp.einsum("bhqd,bhkd->bhqk", qh, kh, preferred_element_type=f32)
        att = jax.nn.softmax(att, axis=-1)
        ctx = jnp.einsum("bhqk,bhkd->bhqd", att.astype(bf), vh,
                         preferred_element_type=f32)
        ctx = ctx.transpose(0, 2, 1, 3).reshape(B, S, E)
        x1 = x + mm(ctx, p["wo"]) + p["bo"]
        yn = ln(x1, p["ln2_g"], p["ln2_b"])
        h = jax.nn.gelu(mm(yn, p["w1"]) + p["b1"], approximate=False)
        x = x1 + mm(h, p["w2"]) + p["b2"]
    return ln(x, params["ln_g"], params["ln_b"])


# ----------------------------------- demo -------------------------------------

if __name__ == "__main__":
    # Small shapes consistent with Encoder.forward: (batch, seq, embed_dim).
    B, S, E, MLP_DIM, HEADS, LAYERS = 2, 8, 32, 64, 4, 2

    key = jax.random.PRNGKey(0)
    kx, kp = jax.random.split(key)
    x = jax.random.normal(kx, (B, S, E), jnp.float32)
    params = init_params(kp, E, MLP_DIM, LAYERS)

    out = encoder_forward(x, params, head_num=HEADS)
    out = jax.block_until_ready(out)

    ref = reference(x, params, head_num=HEADS)
    assert out.shape == (B, S, E), out.shape
    # bf16 matmul operands + approx reciprocal -> tolerance re-derived vs the
    # mixed-precision reference.
    assert jnp.allclose(out, ref, atol=5e-3, rtol=5e-3), \
        float(jnp.max(jnp.abs(out - ref)))
    print("KERNEL_OK")
</pallas_src>

<mosaic_0001>
module attributes {stable_mosaic.version = 11 : i64} {
  func.func @encoder_layer_kernel(%arg0: i32, %arg1: memref<1x8x32xf32, #tpu.memory_space<vmem>>, %arg2: memref<32x96xbf16, #tpu.memory_space<vmem>>, %arg3: memref<1x96xf32, #tpu.memory_space<vmem>>, %arg4: memref<32x32xbf16, #tpu.memory_space<vmem>>, %arg5: memref<1x32xf32, #tpu.memory_space<vmem>>, %arg6: memref<1x32xf32, #tpu.memory_space<vmem>>, %arg7: memref<1x32xf32, #tpu.memory_space<vmem>>, %arg8: memref<1x32xf32, #tpu.memory_space<vmem>>, %arg9: memref<1x32xf32, #tpu.memory_space<vmem>>, %arg10: memref<32x64xbf16, #tpu.memory_space<vmem>>, %arg11: memref<1x64xf32, #tpu.memory_space<vmem>>, %arg12: memref<64x32xbf16, #tpu.memory_space<vmem>>, %arg13: memref<1x32xf32, #tpu.memory_space<vmem>>, %arg14: memref<1x8x32xf32, #tpu.memory_space<vmem>>, %arg15: memref<8x32xf32, #tpu.memory_space<vmem>>) attributes {dimension_semantics = [#tpu.dimension_semantics<parallel>], iteration_bounds = array<i64: 2>, scalar_prefetch = 0 : i64, scratch_operands = 1 : i64, tpu.core_type = #tpu.core_type<tc>, window_params = [{transform_indices = @transform_0, window_bounds = array<i64: 1, 8, 32>}, {pipeline_mode = #tpu.pipeline_mode<synchronous>, transform_indices = @transform_1, window_bounds = array<i64: 32, 96>}, {pipeline_mode = #tpu.pipeline_mode<synchronous>, transform_indices = @transform_2, window_bounds = array<i64: 1, 96>}, {pipeline_mode = #tpu.pipeline_mode<synchronous>, transform_indices = @transform_3, window_bounds = array<i64: 32, 32>}, {pipeline_mode = #tpu.pipeline_mode<synchronous>, transform_indices = @transform_4, window_bounds = array<i64: 1, 32>}, {pipeline_mode = #tpu.pipeline_mode<synchronous>, transform_indices = @transform_5, window_bounds = array<i64: 1, 32>}, {pipeline_mode = #tpu.pipeline_mode<synchronous>, transform_indices = @transform_6, window_bounds = array<i64: 1, 32>}, {pipeline_mode = #tpu.pipeline_mode<synchronous>, transform_indices = @transform_7, window_bounds = array<i64: 1, 32>}, {pipeline_mode = #tpu.pipeline_mode<synchronous>, transform_indices = @transform_8, window_bounds = array<i64: 1, 32>}, {pipeline_mode = #tpu.pipeline_mode<synchronous>, transform_indices = @transform_9, window_bounds = array<i64: 32, 64>}, {pipeline_mode = #tpu.pipeline_mode<synchronous>, transform_indices = @transform_10, window_bounds = array<i64: 1, 64>}, {pipeline_mode = #tpu.pipeline_mode<synchronous>, transform_indices = @transform_11, window_bounds = array<i64: 64, 32>}, {pipeline_mode = #tpu.pipeline_mode<synchronous>, transform_indices = @transform_12, window_bounds = array<i64: 1, 32>}, {transform_indices = @transform_13, window_bounds = array<i64: 1, 8, 32>}]} {
    %c0 = arith.constant 0 : index
    %c0_0 = arith.constant 0 : index
    %c0_1 = arith.constant 0 : index
    %0 = vector.load %arg1[%c0, %c0_0, %c0_1] : memref<1x8x32xf32, #tpu.memory_space<vmem>>, vector<1x8x32xf32>
    %1 = vector.shape_cast %0 : vector<1x8x32xf32> to vector<8x32xf32>
    %c0_2 = arith.constant 0 : index
    %c0_3 = arith.constant 0 : index
    %2 = vector.load %arg6[%c0_2, %c0_3] : memref<1x32xf32, #tpu.memory_space<vmem>>, vector<1x32xf32>
    %c0_4 = arith.constant 0 : index
    %c0_5 = arith.constant 0 : index
    %3 = vector.load %arg7[%c0_4, %c0_5] : memref<1x32xf32, #tpu.memory_space<vmem>>, vector<1x32xf32>
    %cst = arith.constant dense<0.000000e+00> : vector<8xf32>
    %4 = vector.multi_reduction <add>, %1, %cst [1] : vector<8x32xf32> to vector<8xf32>
    %5 = vector.shape_cast %4 : vector<8xf32> to vector<8x1xf32>
    %cst_6 = arith.constant 3.200000e+01 : f32
    %6 = vector.broadcast %cst_6 : f32 to vector<8x1xf32>
    %7 = arith.divf %5, %6 : vector<8x1xf32>
    %8 = vector.broadcast %7 : vector<8x1xf32> to vector<8x32xf32>
    %9 = arith.subf %1, %8 : vector<8x32xf32>
    %10 = arith.mulf %9, %9 : vector<8x32xf32>
    %cst_7 = arith.constant dense<0.000000e+00> : vector<8xf32>
    %11 = vector.multi_reduction <add>, %10, %cst_7 [1] : vector<8x32xf32> to vector<8xf32>
    %12 = vector.shape_cast %11 : vector<8xf32> to vector<8x1xf32>
    %cst_8 = arith.constant 3.200000e+01 : f32
    %13 = vector.broadcast %cst_8 : f32 to vector<8x1xf32>
    %14 = arith.divf %12, %13 : vector<8x1xf32>
    %15 = vector.broadcast %7 : vector<8x1xf32> to vector<8x32xf32>
    %16 = arith.subf %1, %15 : vector<8x32xf32>
    %cst_9 = arith.constant 9.99999974E-6 : f32
    %17 = vector.broadcast %cst_9 : f32 to vector<8x1xf32>
    %18 = arith.addf %14, %17 : vector<8x1xf32>
    %19 = math.rsqrt %18 : vector<8x1xf32>
    %20 = vector.broadcast %19 : vector<8x1xf32> to vector<8x32xf32>
    %21 = arith.mulf %16, %20 : vector<8x32xf32>
    %22 = vector.broadcast %2 : vector<1x32xf32> to vector<8x32xf32>
    %23 = arith.mulf %21, %22 : vector<8x32xf32>
    %24 = vector.broadcast %3 : vector<1x32xf32> to vector<8x32xf32>
    %25 = arith.addf %23, %24 : vector<8x32xf32>
    %26 = arith.truncf %25 : vector<8x32xf32> to vector<8x32xbf16>
    %c0_10 = arith.constant 0 : index
    %c0_11 = arith.constant 0 : index
    %27 = vector.load %arg2[%c0_10, %c0_11] : memref<32x96xbf16, #tpu.memory_space<vmem>>, vector<32x96xbf16>
    %cst_12 = arith.constant dense<0.000000e+00> : vector<8x96xf32>
    %28 = tpu.matmul %26, %27, %cst_12 {dimension_numbers = #tpu.dot_dimension_numbers<[1], [0], [0], [1], [0, 0, 1, 1], [], []>} : vector<8x32xbf16>, vector<32x96xbf16>, vector<8x96xf32> -> vector<8x96xf32>
    %c0_13 = arith.constant 0 : index
    %c0_14 = arith.constant 0 : index
    %29 = vector.load %arg3[%c0_13, %c0_14] : memref<1x96xf32, #tpu.memory_space<vmem>>, vector<1x96xf32>
    %30 = vector.broadcast %29 : vector<1x96xf32> to vector<8x96xf32>
    %31 = arith.addf %28, %30 : vector<8x96xf32>
    %32 = vector.extract_strided_slice %31 {offsets = [0, 0], sizes = [8, 32], strides = [1, 1]} : vector<8x96xf32> to vector<8x32xf32>
    %cst_15 = arith.constant 0.353553385 : f32
    %33 = vector.broadcast %cst_15 : f32 to vector<8x32xf32>
    %34 = arith.mulf %32, %33 : vector<8x32xf32>
    %35 = arith.truncf %34 : vector<8x32xf32> to vector<8x32xbf16>
    %36 = vector.extract_strided_slice %31 {offsets = [0, 32], sizes = [8, 32], strides = [1, 1]} : vector<8x96xf32> to vector<8x32xf32>
    %37 = arith.truncf %36 : vector<8x32xf32> to vector<8x32xbf16>
    %38 = vector.extract_strided_slice %31 {offsets = [0, 64], sizes = [8, 32], strides = [1, 1]} : vector<8x96xf32> to vector<8x32xf32>
    %39 = arith.truncf %38 : vector<8x32xf32> to vector<8x32xbf16>
    %40 = vector.extract_strided_slice %35 {offsets = [0, 0], sizes = [8, 8], strides = [1, 1]} : vector<8x32xbf16> to vector<8x8xbf16>
    %41 = vector.extract_strided_slice %37 {offsets = [0, 0], sizes = [8, 8], strides = [1, 1]} : vector<8x32xbf16> to vector<8x8xbf16>
    %42 = vector.extract_strided_slice %39 {offsets = [0, 0], sizes = [8, 8], strides = [1, 1]} : vector<8x32xbf16> to vector<8x8xbf16>
    %cst_16 = arith.constant dense<0.000000e+00> : vector<8x8xf32>
    %43 = tpu.matmul %40, %41, %cst_16 {dimension_numbers = #tpu.dot_dimension_numbers<[1], [1], [0], [0], [0, 0, 1, 0], [], []>} : vector<8x8xbf16>, vector<8x8xbf16>, vector<8x8xf32> -> vector<8x8xf32>
    %cst_17 = arith.constant dense<0xFF800000> : vector<8xf32>
    %44 = vector.multi_reduction <maximumf>, %43, %cst_17 [1] : vector<8x8xf32> to vector<8xf32>
    %45 = vector.shape_cast %44 : vector<8xf32> to vector<8x1xf32>
    %46 = vector.broadcast %45 : vector<8x1xf32> to vector<8x8xf32>
    %47 = arith.subf %43, %46 : vector<8x8xf32>
    %48 = math.exp %47 : vector<8x8xf32>
    %cst_18 = arith.constant dense<0.000000e+00> : vector<8xf32>
    %49 = vector.multi_reduction <add>, %48, %cst_18 [1] : vector<8x8xf32> to vector<8xf32>
    %50 = vector.shape_cast %49 : vector<8xf32> to vector<8x1xf32>
    %51 = tpu.reciprocal %50 {approx = true} : vector<8x1xf32> -> vector<8x1xf32>
    %52 = vector.broadcast %51 : vector<8x1xf32> to vector<8x8xf32>
    %53 = arith.mulf %48, %52 : vector<8x8xf32>
    %54 = arith.truncf %53 : vector<8x8xf32> to vector<8x8xbf16>
    %cst_19 = arith.constant dense<0.000000e+00> : vector<8x8xf32>
    %55 = tpu.matmul %54, %42, %cst_19 {dimension_numbers = #tpu.dot_dimension_numbers<[1], [0], [0], [1], [0, 0, 1, 1], [], []>} : vector<8x8xbf16>, vector<8x8xbf16>, vector<8x8xf32> -> vector<8x8xf32>
    %c0_20 = arith.constant 0 : index
    %c0_21 = arith.constant 0 : index
    %56 = vector.load %arg15[%c0_20, %c0_21] : memref<8x32xf32, #tpu.memory_space<vmem>>, vector<8x8xf32>
    tpu.vector_store %arg15[%c0_20, %c0_21], %55 {strides = array<i32>} : memref<8x32xf32, #tpu.memory_space<vmem>>, vector<8x8xf32>,
    %57 = vector.extract_strided_slice %35 {offsets = [0, 8], sizes = [8, 8], strides = [1, 1]} : vector<8x32xbf16> to vector<8x8xbf16>
    %58 = vector.extract_strided_slice %37 {offsets = [0, 8], sizes = [8, 8], strides = [1, 1]} : vector<8x32xbf16> to vector<8x8xbf16>
    %59 = vector.extract_strided_slice %39 {offsets = [0, 8], sizes = [8, 8], strides = [1, 1]} : vector<8x32xbf16> to vector<8x8xbf16>
    %cst_22 = arith.constant dense<0.000000e+00> : vector<8x8xf32>
    %60 = tpu.matmul %57, %58, %cst_22 {dimension_numbers = #tpu.dot_dimension_numbers<[1], [1], [0], [0], [0, 0, 1, 0], [], []>} : vector<8x8xbf16>, vector<8x8xbf16>, vector<8x8xf32> -> vector<8x8xf32>
    %cst_23 = arith.constant dense<0xFF800000> : vector<8xf32>
    %61 = vector.multi_reduction <maximumf>, %60, %cst_23 [1] : vector<8x8xf32> to vector<8xf32>
    %62 = vector.shape_cast %61 : vector<8xf32> to vector<8x1xf32>
    %63 = vector.broadcast %62 : vector<8x1xf32> to vector<8x8xf32>
    %64 = arith.subf %60, %63 : vector<8x8xf32>
    %65 = math.exp %64 : vector<8x8xf32>
    %cst_24 = arith.constant dense<0.000000e+00> : vector<8xf32>
    %66 = vector.multi_reduction <add>, %65, %cst_24 [1] : vector<8x8xf32> to vector<8xf32>
    %67 = vector.shape_cast %66 : vector<8xf32> to vector<8x1xf32>
    %68 = tpu.reciprocal %67 {approx = true} : vector<8x1xf32> -> vector<8x1xf32>
    %69 = vector.broadcast %68 : vector<8x1xf32> to vector<8x8xf32>
    %70 = arith.mulf %65, %69 : vector<8x8xf32>
    %71 = arith.truncf %70 : vector<8x8xf32> to vector<8x8xbf16>
    %cst_25 = arith.constant dense<0.000000e+00> : vector<8x8xf32>
    %72 = tpu.matmul %71, %59, %cst_25 {dimension_numbers = #tpu.dot_dimension_numbers<[1], [0], [0], [1], [0, 0, 1, 1], [], []>} : vector<8x8xbf16>, vector<8x8xbf16>, vector<8x8xf32> -> vector<8x8xf32>
    %c0_26 = arith.constant 0 : index
    %c8 = arith.constant 8 : index
    %73 = vector.load %arg15[%c0_26, %c8] : memref<8x32xf32, #tpu.memory_space<vmem>>, vector<8x8xf32>
    tpu.vector_store %arg15[%c0_26, %c8], %72 {strides = array<i32>} : memref<8x32xf32, #tpu.memory_space<vmem>>, vector<8x8xf32>,
    %74 = vector.extract_strided_slice %35 {offsets = [0, 16], sizes = [8, 8], strides = [1, 1]} : vector<8x32xbf16> to vector<8x8xbf16>
    %75 = vector.extract_strided_slice %37 {offsets = [0, 16], sizes = [8, 8], strides = [1, 1]} : vector<8x32xbf16> to vector<8x8xbf16>
    %76 = vector.extract_strided_slice %39 {offsets = [0, 16], sizes = [8, 8], strides = [1, 1]} : vector<8x32xbf16> to vector<8x8xbf16>
    %cst_27 = arith.constant dense<0.000000e+00> : vector<8x8xf32>
    %77 = tpu.matmul %74, %75, %cst_27 {dimension_numbers = #tpu.dot_dimension_numbers<[1], [1], [0], [0], [0, 0, 1, 0], [], []>} : vector<8x8xbf16>, vector<8x8xbf16>, vector<8x8xf32> -> vector<8x8xf32>
    %cst_28 = arith.constant dense<0xFF800000> : vector<8xf32>
    %78 = vector.multi_reduction <maximumf>, %77, %cst_28 [1] : vector<8x8xf32> to vector<8xf32>
    %79 = vector.shape_cast %78 : vector<8xf32> to vector<8x1xf32>
    %80 = vector.broadcast %79 : vector<8x1xf32> to vector<8x8xf32>
    %81 = arith.subf %77, %80 : vector<8x8xf32>
    %82 = math.exp %81 : vector<8x8xf32>
    %cst_29 = arith.constant dense<0.000000e+00> : vector<8xf32>
    %83 = vector.multi_reduction <add>, %82, %cst_29 [1] : vector<8x8xf32> to vector<8xf32>
    %84 = vector.shape_cast %83 : vector<8xf32> to vector<8x1xf32>
    %85 = tpu.reciprocal %84 {approx = true} : vector<8x1xf32> -> vector<8x1xf32>
    %86 = vector.broadcast %85 : vector<8x1xf32> to vector<8x8xf32>
    %87 = arith.mulf %82, %86 : vector<8x8xf32>
    %88 = arith.truncf %87 : vector<8x8xf32> to vector<8x8xbf16>
    %cst_30 = arith.constant dense<0.000000e+00> : vector<8x8xf32>
    %89 = tpu.matmul %88, %76, %cst_30 {dimension_numbers = #tpu.dot_dimension_numbers<[1], [0], [0], [1], [0, 0, 1, 1], [], []>} : vector<8x8xbf16>, vector<8x8xbf16>, vector<8x8xf32> -> vector<8x8xf32>
    %c0_31 = arith.constant 0 : index
    %c16 = arith.constant 16 : index
    %90 = vector.load %arg15[%c0_31, %c16] : memref<8x32xf32, #tpu.memory_space<vmem>>, vector<8x8xf32>
    tpu.vector_store %arg15[%c0_31, %c16], %89 {strides = array<i32>} : memref<8x32xf32, #tpu.memory_space<vmem>>, vector<8x8xf32>,
    %91 = vector.extract_strided_slice %35 {offsets = [0, 24], sizes = [8, 8], strides = [1, 1]} : vector<8x32xbf16> to vector<8x8xbf16>
    %92 = vector.extract_strided_slice %37 {offsets = [0, 24], sizes = [8, 8], strides = [1, 1]} : vector<8x32xbf16> to vector<8x8xbf16>
    %93 = vector.extract_strided_slice %39 {offsets = [0, 24], sizes = [8, 8], strides = [1, 1]} : vector<8x32xbf16> to vector<8x8xbf16>
    %cst_32 = arith.constant dense<0.000000e+00> : vector<8x8xf32>
    %94 = tpu.matmul %91, %92, %cst_32 {dimension_numbers = #tpu.dot_dimension_numbers<[1], [1], [0], [0], [0, 0, 1, 0], [], []>} : vector<8x8xbf16>, vector<8x8xbf16>, vector<8x8xf32> -> vector<8x8xf32>
    %cst_33 = arith.constant dense<0xFF800000> : vector<8xf32>
    %95 = vector.multi_reduction <maximumf>, %94, %cst_33 [1] : vector<8x8xf32> to vector<8xf32>
    %96 = vector.shape_cast %95 : vector<8xf32> to vector<8x1xf32>
    %97 = vector.broadcast %96 : vector<8x1xf32> to vector<8x8xf32>
    %98 = arith.subf %94, %97 : vector<8x8xf32>
    %99 = math.exp %98 : vector<8x8xf32>
    %cst_34 = arith.constant dense<0.000000e+00> : vector<8xf32>
    %100 = vector.multi_reduction <add>, %99, %cst_34 [1] : vector<8x8xf32> to vector<8xf32>
    %101 = vector.shape_cast %100 : vector<8xf32> to vector<8x1xf32>
    %102 = tpu.reciprocal %101 {approx = true} : vector<8x1xf32> -> vector<8x1xf32>
    %103 = vector.broadcast %102 : vector<8x1xf32> to vector<8x8xf32>
    %104 = arith.mulf %99, %103 : vector<8x8xf32>
    %105 = arith.truncf %104 : vector<8x8xf32> to vector<8x8xbf16>
    %cst_35 = arith.constant dense<0.000000e+00> : vector<8x8xf32>
    %106 = tpu.matmul %105, %93, %cst_35 {dimension_numbers = #tpu.dot_dimension_numbers<[1], [0], [0], [1], [0, 0, 1, 1], [], []>} : vector<8x8xbf16>, vector<8x8xbf16>, vector<8x8xf32> -> vector<8x8xf32>
    %c0_36 = arith.constant 0 : index
    %c24 = arith.constant 24 : index
    %107 = vector.load %arg15[%c0_36, %c24] : memref<8x32xf32, #tpu.memory_space<vmem>>, vector<8x8xf32>
    tpu.vector_store %arg15[%c0_36, %c24], %106 {strides = array<i32>} : memref<8x32xf32, #tpu.memory_space<vmem>>, vector<8x8xf32>,
    %c0_37 = arith.constant 0 : index
    %c0_38 = arith.constant 0 : index
    %108 = vector.load %arg15[%c0_37, %c0_38] : memref<8x32xf32, #tpu.memory_space<vmem>>, vector<8x32xf32>
    %109 = arith.truncf %108 : vector<8x32xf32> to vector<8x32xbf16>
    %c0_39 = arith.constant 0 : index
    %c0_40 = arith.constant 0 : index
    %110 = vector.load %arg4[%c0_39, %c0_40] : memref<32x32xbf16, #tpu.memory_space<vmem>>, vector<32x32xbf16>
    %cst_41 = arith.constant dense<0.000000e+00> : vector<8x32xf32>
    %111 = tpu.matmul %109, %110, %cst_41 {dimension_numbers = #tpu.dot_dimension_numbers<[1], [0], [0], [1], [0, 0, 1, 1], [], []>} : vector<8x32xbf16>, vector<32x32xbf16>, vector<8x32xf32> -> vector<8x32xf32>
    %c0_42 = arith.constant 0 : index
    %c0_43 = arith.constant 0 : index
    %112 = vector.load %arg5[%c0_42, %c0_43] : memref<1x32xf32, #tpu.memory_space<vmem>>, vector<1x32xf32>
    %113 = vector.broadcast %112 : vector<1x32xf32> to vector<8x32xf32>
    %114 = arith.addf %111, %113 : vector<8x32xf32>
    %115 = arith.addf %1, %114 : vector<8x32xf32>
    %c0_44 = arith.constant 0 : index
    %c0_45 = arith.constant 0 : index
    %116 = vector.load %arg8[%c0_44, %c0_45] : memref<1x32xf32, #tpu.memory_space<vmem>>, vector<1x32xf32>
    %c0_46 = arith.constant 0 : index
    %c0_47 = arith.constant 0 : index
    %117 = vector.load %arg9[%c0_46, %c0_47] : memref<1x32xf32, #tpu.memory_space<vmem>>, vector<1x32xf32>
    %cst_48 = arith.constant dense<0.000000e+00> : vector<8xf32>
    %118 = vector.multi_reduction <add>, %115, %cst_48 [1] : vector<8x32xf32> to vector<8xf32>
    %119 = vector.shape_cast %118 : vector<8xf32> to vector<8x1xf32>
    %cst_49 = arith.constant 3.200000e+01 : f32
    %120 = vector.broadcast %cst_49 : f32 to vector<8x1xf32>
    %121 = arith.divf %119, %120 : vector<8x1xf32>
    %122 = vector.broadcast %121 : vector<8x1xf32> to vector<8x32xf32>
    %123 = arith.subf %115, %122 : vector<8x32xf32>
    %124 = arith.mulf %123, %123 : vector<8x32xf32>
    %cst_50 = arith.constant dense<0.000000e+00> : vector<8xf32>
    %125 = vector.multi_reduction <add>, %124, %cst_50 [1] : vector<8x32xf32> to vector<8xf32>
    %126 = vector.shape_cast %125 : vector<8xf32> to vector<8x1xf32>
    %cst_51 = arith.constant 3.200000e+01 : f32
    %127 = vector.broadcast %cst_51 : f32 to vector<8x1xf32>
    %128 = arith.divf %126, %127 : vector<8x1xf32>
    %129 = vector.broadcast %121 : vector<8x1xf32> to vector<8x32xf32>
    %130 = arith.subf %115, %129 : vector<8x32xf32>
    %cst_52 = arith.constant 9.99999974E-6 : f32
    %131 = vector.broadcast %cst_52 : f32 to vector<8x1xf32>
    %132 = arith.addf %128, %131 : vector<8x1xf32>
    %133 = math.rsqrt %132 : vector<8x1xf32>
    %134 = vector.broadcast %133 : vector<8x1xf32> to vector<8x32xf32>
    %135 = arith.mulf %130, %134 : vector<8x32xf32>
    %136 = vector.broadcast %116 : vector<1x32xf32> to vector<8x32xf32>
    %137 = arith.mulf %135, %136 : vector<8x32xf32>
    %138 = vector.broadcast %117 : vector<1x32xf32> to vector<8x32xf32>
    %139 = arith.addf %137, %138 : vector<8x32xf32>
    %140 = arith.truncf %139 : vector<8x32xf32> to vector<8x32xbf16>
    %c0_53 = arith.constant 0 : index
    %c0_54 = arith.constant 0 : index
    %141 = vector.load %arg10[%c0_53, %c0_54] : memref<32x64xbf16, #tpu.memory_space<vmem>>, vector<32x64xbf16>
    %cst_55 = arith.constant dense<0.000000e+00> : vector<8x64xf32>
    %142 = tpu.matmul %140, %141, %cst_55 {dimension_numbers = #tpu.dot_dimension_numbers<[1], [0], [0], [1], [0, 0, 1, 1], [], []>} : vector<8x32xbf16>, vector<32x64xbf16>, vector<8x64xf32> -> vector<8x64xf32>
    %c0_56 = arith.constant 0 : index
    %c0_57 = arith.constant 0 : index
    %143 = vector.load %arg11[%c0_56, %c0_57] : memref<1x64xf32, #tpu.memory_space<vmem>>, vector<1x64xf32>
    %144 = vector.broadcast %143 : vector<1x64xf32> to vector<8x64xf32>
    %145 = arith.addf %142, %144 : vector<8x64xf32>
    %cst_58 = arith.constant 5.000000e-01 : f32
    %146 = vector.broadcast %cst_58 : f32 to vector<8x64xf32>
    %147 = arith.mulf %146, %145 : vector<8x64xf32>
    %cst_59 = arith.constant 0.707106769 : f32
    %148 = vector.broadcast %cst_59 : f32 to vector<8x64xf32>
    %149 = arith.mulf %145, %148 : vector<8x64xf32>
    %150 = math.absf %149 : vector<8x64xf32>
    %cst_60 = arith.constant 0.327591091 : f32
    %151 = vector.broadcast %cst_60 : f32 to vector<8x64xf32>
    %152 = arith.mulf %151, %150 : vector<8x64xf32>
    %cst_61 = arith.constant 1.000000e+00 : f32
    %153 = vector.broadcast %cst_61 : f32 to vector<8x64xf32>
    %154 = arith.addf %153, %152 : vector<8x64xf32>
    %cst_62 = arith.constant 1.000000e+00 : f32
    %155 = vector.broadcast %cst_62 : f32 to vector<8x64xf32>
    %156 = arith.divf %155, %154 : vector<8x64xf32>
    %cst_63 = arith.constant 1.06140542 : f32
    %157 = vector.broadcast %cst_63 : f32 to vector<8x64xf32>
    %158 = arith.mulf %157, %156 : vector<8x64xf32>
    %cst_64 = arith.constant -1.45315206 : f32
    %159 = vector.broadcast %cst_64 : f32 to vector<8x64xf32>
    %160 = arith.addf %158, %159 : vector<8x64xf32>
    %161 = arith.mulf %160, %156 : vector<8x64xf32>
    %cst_65 = arith.constant 1.42141378 : f32
    %162 = vector.broadcast %cst_65 : f32 to vector<8x64xf32>
    %163 = arith.addf %161, %162 : vector<8x64xf32>
    %164 = arith.mulf %163, %156 : vector<8x64xf32>
    %cst_66 = arith.constant -0.284496725 : f32
    %165 = vector.broadcast %cst_66 : f32 to vector<8x64xf32>
    %166 = arith.addf %164, %165 : vector<8x64xf32>
    %167 = arith.mulf %166, %156 : vector<8x64xf32>
    %cst_67 = arith.constant 0.254829586 : f32
    %168 = vector.broadcast %cst_67 : f32 to vector<8x64xf32>
    %169 = arith.addf %167, %168 : vector<8x64xf32>
    %170 = arith.mulf %169, %156 : vector<8x64xf32>
    %cst_68 = arith.constant 0.000000e+00 : f32
    %171 = vector.broadcast %cst_68 : f32 to vector<8x64xf32>
    %172 = arith.subf %171, %150 : vector<8x64xf32>
    %173 = arith.mulf %172, %150 : vector<8x64xf32>
    %174 = math.exp %173 : vector<8x64xf32>
    %175 = arith.mulf %170, %174 : vector<8x64xf32>
    %cst_69 = arith.constant 1.000000e+00 : f32
    %176 = vector.broadcast %cst_69 : f32 to vector<8x64xf32>
    %177 = arith.subf %176, %175 : vector<8x64xf32>
    %cst_70 = arith.constant 0.000000e+00 : f32
    %178 = vector.broadcast %cst_70 : f32 to vector<8x64xf32>
    %179 = arith.cmpf oge, %149, %178 : vector<8x64xf32>
    %cst_71 = arith.constant 0.000000e+00 : f32
    %180 = vector.broadcast %cst_71 : f32 to vector<8x64xf32>
    %181 = arith.subf %180, %177 : vector<8x64xf32>
    %182 = arith.select %179, %177, %181 : vector<8x64xi1>, vector<8x64xf32>
    %cst_72 = arith.constant 1.000000e+00 : f32
    %183 = vector.broadcast %cst_72 : f32 to vector<8x64xf32>
    %184 = arith.addf %183, %182 : vector<8x64xf32>
    %185 = arith.mulf %147, %184 : vector<8x64xf32>
    %186 = arith.truncf %185 : vector<8x64xf32> to vector<8x64xbf16>
    %c0_73 = arith.constant 0 : index
    %c0_74 = arith.constant 0 : index
    %187 = vector.load %arg12[%c0_73, %c0_74] : memref<64x32xbf16, #tpu.memory_space<vmem>>, vector<64x32xbf16>
    %cst_75 = arith.constant dense<0.000000e+00> : vector<8x32xf32>
    %188 = tpu.matmul %186, %187, %cst_75 {dimension_numbers = #tpu.dot_dimension_numbers<[1], [0], [0], [1], [0, 0, 1, 1], [], []>} : vector<8x64xbf16>, vector<64x32xbf16>, vector<8x32xf32> -> vector<8x32xf32>
    %c0_76 = arith.constant 0 : index
    %c0_77 = arith.constant 0 : index
    %189 = vector.load %arg13[%c0_76, %c0_77] : memref<1x32xf32, #tpu.memory_space<vmem>>, vector<1x32xf32>
    %190 = vector.broadcast %189 : vector<1x32xf32> to vector<8x32xf32>
    %191 = arith.addf %188, %190 : vector<8x32xf32>
    %192 = arith.addf %115, %191 : vector<8x32xf32>
    %c0_78 = arith.constant 0 : index
    %c0_79 = arith.constant 0 : index
    %c0_80 = arith.constant 0 : index
    %193 = vector.load %arg14[%c0_78, %c0_79, %c0_80] : memref<1x8x32xf32, #tpu.memory_space<vmem>>, vector<1x8x32xf32>
    %194 = vector.shape_cast %193 : vector<1x8x32xf32> to vector<8x32xf32>
    %195 = vector.shape_cast %192 : vector<8x32xf32> to vector<1x8x32xf32>
    tpu.vector_store %arg14[%c0_78, %c0_79, %c0_80], %195 {strides = array<i32>} : memref<1x8x32xf32, #tpu.memory_space<vmem>>, vector<1x8x32xf32>,
    return
  }
  func.func @transform_0(%arg0: i32) -> (i32, i32, i32) {
    %c0_i32 = arith.constant 0 : i32
    %c0_i32_0 = arith.constant 0 : i32
    %c0_i32_1 = arith.constant 0 : i32
    return %arg0, %c0_i32, %c0_i32_0 : i32, i32, i32
  }
  func.func @transform_1(%arg0: i32) -> (i32, i32) {
    %c0_i32 = arith.constant 0 : i32
    %c0_i32_0 = arith.constant 0 : i32
    %c0_i32_1 = arith.constant 0 : i32
    return %c0_i32, %c0_i32_0 : i32, i32
  }
  func.func @transform_2(%arg0: i32) -> (i32, i32) {
    %c0_i32 = arith.constant 0 : i32
    %c0_i32_0 = arith.constant 0 : i32
    %c0_i32_1 = arith.constant 0 : i32
    return %c0_i32, %c0_i32_0 : i32, i32
  }
  func.func @transform_3(%arg0: i32) -> (i32, i32) {
    %c0_i32 = arith.constant 0 : i32
    %c0_i32_0 = arith.constant 0 : i32
    %c0_i32_1 = arith.constant 0 : i32
    return %c0_i32, %c0_i32_0 : i32, i32
  }
  func.func @transform_4(%arg0: i32) -> (i32, i32) {
    %c0_i32 = arith.constant 0 : i32
    %c0_i32_0 = arith.constant 0 : i32
    %c0_i32_1 = arith.constant 0 : i32
    return %c0_i32, %c0_i32_0 : i32, i32
  }
  func.func @transform_5(%arg0: i32) -> (i32, i32) {
    %c0_i32 = arith.constant 0 : i32
    %c0_i32_0 = arith.constant 0 : i32
    %c0_i32_1 = arith.constant 0 : i32
    return %c0_i32, %c0_i32_0 : i32, i32
  }
  func.func @transform_6(%arg0: i32) -> (i32, i32) {
    %c0_i32 = arith.constant 0 : i32
    %c0_i32_0 = arith.constant 0 : i32
    %c0_i32_1 = arith.constant 0 : i32
    return %c0_i32, %c0_i32_0 : i32, i32
  }
  func.func @transform_7(%arg0: i32) -> (i32, i32) {
    %c0_i32 = arith.constant 0 : i32
    %c0_i32_0 = arith.constant 0 : i32
    %c0_i32_1 = arith.constant 0 : i32
    return %c0_i32, %c0_i32_0 : i32, i32
  }
  func.func @transform_8(%arg0: i32) -> (i32, i32) {
    %c0_i32 = arith.constant 0 : i32
    %c0_i32_0 = arith.constant 0 : i32
    %c0_i32_1 = arith.constant 0 : i32
    return %c0_i32, %c0_i32_0 : i32, i32
  }
  func.func @transform_9(%arg0: i32) -> (i32, i32) {
    %c0_i32 = arith.constant 0 : i32
    %c0_i32_0 = arith.constant 0 : i32
    %c0_i32_1 = arith.constant 0 : i32
    return %c0_i32, %c0_i32_0 : i32, i32
  }
  func.func @transform_10(%arg0: i32) -> (i32, i32) {
    %c0_i32 = arith.constant 0 : i32
    %c0_i32_0 = arith.constant 0 : i32
    %c0_i32_1 = arith.constant 0 : i32
    return %c0_i32, %c0_i32_0 : i32, i32
  }
  func.func @transform_11(%arg0: i32) -> (i32, i32) {
    %c0_i32 = arith.constant 0 : i32
    %c0_i32_0 = arith.constant 0 : i32
    %c0_i32_1 = arith.constant 0 : i32
    return %c0_i32, %c0_i32_0 : i32, i32
  }
  func.func @transform_12(%arg0: i32) -> (i32, i32) {
    %c0_i32 = arith.constant 0 : i32
    %c0_i32_0 = arith.constant 0 : i32
    %c0_i32_1 = arith.constant 0 : i32
    return %c0_i32, %c0_i32_0 : i32, i32
  }
  func.func @transform_13(%arg0: i32) -> (i32, i32, i32) {
    %c0_i32 = arith.constant 0 : i32
    %c0_i32_0 = arith.constant 0 : i32
    %c0_i32_1 = arith.constant 0 : i32
    return %arg0, %c0_i32, %c0_i32_0 : i32, i32, i32
  }
}

module attributes {stable_mosaic.version = 11 : i64} {
  func.func @encoder_layer_kernel(%arg0: i32, %arg1: memref<1x8x32xf32, #tpu.memory_space<vmem>>, %arg2: memref<32x96xbf16, #tpu.memory_space<vmem>>, %arg3: memref<1x96xf32, #tpu.memory_space<vmem>>, %arg4: memref<32x32xbf16, #tpu.memory_space<vmem>>, %arg5: memref<1x32xf32, #tpu.memory_space<vmem>>, %arg6: memref<1x32xf32, #tpu.memory_space<vmem>>, %arg7: memref<1x32xf32, #tpu.memory_space<vmem>>, %arg8: memref<1x32xf32, #tpu.memory_space<vmem>>, %arg9: memref<1x32xf32, #tpu.memory_space<vmem>>, %arg10: memref<32x64xbf16, #tpu.memory_space<vmem>>, %arg11: memref<1x64xf32, #tpu.memory_space<vmem>>, %arg12: memref<64x32xbf16, #tpu.memory_space<vmem>>, %arg13: memref<1x32xf32, #tpu.memory_space<vmem>>, %arg14: memref<1x8x32xf32, #tpu.memory_space<vmem>>, %arg15: memref<8x32xf32, #tpu.memory_space<vmem>>) attributes {dimension_semantics = [#tpu.dimension_semantics<parallel>], iteration_bounds = array<i64: 2>, scalar_prefetch = 0 : i64, scratch_operands = 1 : i64, tpu.core_type = #tpu.core_type<tc>, window_params = [{transform_indices = @transform_0, window_bounds = array<i64: 1, 8, 32>}, {pipeline_mode = #tpu.pipeline_mode<synchronous>, transform_indices = @transform_1, window_bounds = array<i64: 32, 96>}, {pipeline_mode = #tpu.pipeline_mode<synchronous>, transform_indices = @transform_2, window_bounds = array<i64: 1, 96>}, {pipeline_mode = #tpu.pipeline_mode<synchronous>, transform_indices = @transform_3, window_bounds = array<i64: 32, 32>}, {pipeline_mode = #tpu.pipeline_mode<synchronous>, transform_indices = @transform_4, window_bounds = array<i64: 1, 32>}, {pipeline_mode = #tpu.pipeline_mode<synchronous>, transform_indices = @transform_5, window_bounds = array<i64: 1, 32>}, {pipeline_mode = #tpu.pipeline_mode<synchronous>, transform_indices = @transform_6, window_bounds = array<i64: 1, 32>}, {pipeline_mode = #tpu.pipeline_mode<synchronous>, transform_indices = @transform_7, window_bounds = array<i64: 1, 32>}, {pipeline_mode = #tpu.pipeline_mode<synchronous>, transform_indices = @transform_8, window_bounds = array<i64: 1, 32>}, {pipeline_mode = #tpu.pipeline_mode<synchronous>, transform_indices = @transform_9, window_bounds = array<i64: 32, 64>}, {pipeline_mode = #tpu.pipeline_mode<synchronous>, transform_indices = @transform_10, window_bounds = array<i64: 1, 64>}, {pipeline_mode = #tpu.pipeline_mode<synchronous>, transform_indices = @transform_11, window_bounds = array<i64: 64, 32>}, {pipeline_mode = #tpu.pipeline_mode<synchronous>, transform_indices = @transform_12, window_bounds = array<i64: 1, 32>}, {transform_indices = @transform_13, window_bounds = array<i64: 1, 8, 32>}]} {
    %c0 = arith.constant 0 : index
    %c0_0 = arith.constant 0 : index
    %c0_1 = arith.constant 0 : index
    %0 = vector.load %arg1[%c0, %c0_0, %c0_1] : memref<1x8x32xf32, #tpu.memory_space<vmem>>, vector<1x8x32xf32>
    %1 = vector.shape_cast %0 : vector<1x8x32xf32> to vector<8x32xf32>
    %c0_2 = arith.constant 0 : index
    %c0_3 = arith.constant 0 : index
    %2 = vector.load %arg6[%c0_2, %c0_3] : memref<1x32xf32, #tpu.memory_space<vmem>>, vector<1x32xf32>
    %c0_4 = arith.constant 0 : index
    %c0_5 = arith.constant 0 : index
    %3 = vector.load %arg7[%c0_4, %c0_5] : memref<1x32xf32, #tpu.memory_space<vmem>>, vector<1x32xf32>
    %cst = arith.constant dense<0.000000e+00> : vector<8xf32>
    %4 = vector.multi_reduction <add>, %1, %cst [1] : vector<8x32xf32> to vector<8xf32>
    %5 = vector.shape_cast %4 : vector<8xf32> to vector<8x1xf32>
    %cst_6 = arith.constant 3.200000e+01 : f32
    %6 = vector.broadcast %cst_6 : f32 to vector<8x1xf32>
    %7 = arith.divf %5, %6 : vector<8x1xf32>
    %8 = vector.broadcast %7 : vector<8x1xf32> to vector<8x32xf32>
    %9 = arith.subf %1, %8 : vector<8x32xf32>
    %10 = arith.mulf %9, %9 : vector<8x32xf32>
    %cst_7 = arith.constant dense<0.000000e+00> : vector<8xf32>
    %11 = vector.multi_reduction <add>, %10, %cst_7 [1] : vector<8x32xf32> to vector<8xf32>
    %12 = vector.shape_cast %11 : vector<8xf32> to vector<8x1xf32>
    %cst_8 = arith.constant 3.200000e+01 : f32
    %13 = vector.broadcast %cst_8 : f32 to vector<8x1xf32>
    %14 = arith.divf %12, %13 : vector<8x1xf32>
    %15 = vector.broadcast %7 : vector<8x1xf32> to vector<8x32xf32>
    %16 = arith.subf %1, %15 : vector<8x32xf32>
    %cst_9 = arith.constant 9.99999974E-6 : f32
    %17 = vector.broadcast %cst_9 : f32 to vector<8x1xf32>
    %18 = arith.addf %14, %17 : vector<8x1xf32>
    %19 = math.rsqrt %18 : vector<8x1xf32>
    %20 = vector.broadcast %19 : vector<8x1xf32> to vector<8x32xf32>
    %21 = arith.mulf %16, %20 : vector<8x32xf32>
    %22 = vector.broadcast %2 : vector<1x32xf32> to vector<8x32xf32>
    %23 = arith.mulf %21, %22 : vector<8x32xf32>
    %24 = vector.broadcast %3 : vector<1x32xf32> to vector<8x32xf32>
    %25 = arith.addf %23, %24 : vector<8x32xf32>
    %26 = arith.truncf %25 : vector<8x32xf32> to vector<8x32xbf16>
    %c0_10 = arith.constant 0 : index
    %c0_11 = arith.constant 0 : index
    %27 = vector.load %arg2[%c0_10, %c0_11] : memref<32x96xbf16, #tpu.memory_space<vmem>>, vector<32x96xbf16>
    %cst_12 = arith.constant dense<0.000000e+00> : vector<8x96xf32>
    %28 = tpu.matmul %26, %27, %cst_12 {dimension_numbers = #tpu.dot_dimension_numbers<[1], [0], [0], [1], [0, 0, 1, 1], [], []>} : vector<8x32xbf16>, vector<32x96xbf16>, vector<8x96xf32> -> vector<8x96xf32>
    %c0_13 = arith.constant 0 : index
    %c0_14 = arith.constant 0 : index
    %29 = vector.load %arg3[%c0_13, %c0_14] : memref<1x96xf32, #tpu.memory_space<vmem>>, vector<1x96xf32>
    %30 = vector.broadcast %29 : vector<1x96xf32> to vector<8x96xf32>
    %31 = arith.addf %28, %30 : vector<8x96xf32>
    %32 = vector.extract_strided_slice %31 {offsets = [0, 0], sizes = [8, 32], strides = [1, 1]} : vector<8x96xf32> to vector<8x32xf32>
    %cst_15 = arith.constant 0.353553385 : f32
    %33 = vector.broadcast %cst_15 : f32 to vector<8x32xf32>
    %34 = arith.mulf %32, %33 : vector<8x32xf32>
    %35 = arith.truncf %34 : vector<8x32xf32> to vector<8x32xbf16>
    %36 = vector.extract_strided_slice %31 {offsets = [0, 32], sizes = [8, 32], strides = [1, 1]} : vector<8x96xf32> to vector<8x32xf32>
    %37 = arith.truncf %36 : vector<8x32xf32> to vector<8x32xbf16>
    %38 = vector.extract_strided_slice %31 {offsets = [0, 64], sizes = [8, 32], strides = [1, 1]} : vector<8x96xf32> to vector<8x32xf32>
    %39 = arith.truncf %38 : vector<8x32xf32> to vector<8x32xbf16>
    %40 = vector.extract_strided_slice %35 {offsets = [0, 0], sizes = [8, 8], strides = [1, 1]} : vector<8x32xbf16> to vector<8x8xbf16>
    %41 = vector.extract_strided_slice %37 {offsets = [0, 0], sizes = [8, 8], strides = [1, 1]} : vector<8x32xbf16> to vector<8x8xbf16>
    %42 = vector.extract_strided_slice %39 {offsets = [0, 0], sizes = [8, 8], strides = [1, 1]} : vector<8x32xbf16> to vector<8x8xbf16>
    %cst_16 = arith.constant dense<0.000000e+00> : vector<8x8xf32>
    %43 = tpu.matmul %40, %41, %cst_16 {dimension_numbers = #tpu.dot_dimension_numbers<[1], [1], [0], [0], [0, 0, 1, 0], [], []>} : vector<8x8xbf16>, vector<8x8xbf16>, vector<8x8xf32> -> vector<8x8xf32>
    %cst_17 = arith.constant dense<0xFF800000> : vector<8xf32>
    %44 = vector.multi_reduction <maximumf>, %43, %cst_17 [1] : vector<8x8xf32> to vector<8xf32>
    %45 = vector.shape_cast %44 : vector<8xf32> to vector<8x1xf32>
    %46 = vector.broadcast %45 : vector<8x1xf32> to vector<8x8xf32>
    %47 = arith.subf %43, %46 : vector<8x8xf32>
    %48 = math.exp %47 : vector<8x8xf32>
    %cst_18 = arith.constant dense<0.000000e+00> : vector<8xf32>
    %49 = vector.multi_reduction <add>, %48, %cst_18 [1] : vector<8x8xf32> to vector<8xf32>
    %50 = vector.shape_cast %49 : vector<8xf32> to vector<8x1xf32>
    %51 = tpu.reciprocal %50 {approx = true} : vector<8x1xf32> -> vector<8x1xf32>
    %52 = vector.broadcast %51 : vector<8x1xf32> to vector<8x8xf32>
    %53 = arith.mulf %48, %52 : vector<8x8xf32>
    %54 = arith.truncf %53 : vector<8x8xf32> to vector<8x8xbf16>
    %cst_19 = arith.constant dense<0.000000e+00> : vector<8x8xf32>
    %55 = tpu.matmul %54, %42, %cst_19 {dimension_numbers = #tpu.dot_dimension_numbers<[1], [0], [0], [1], [0, 0, 1, 1], [], []>} : vector<8x8xbf16>, vector<8x8xbf16>, vector<8x8xf32> -> vector<8x8xf32>
    %c0_20 = arith.constant 0 : index
    %c0_21 = arith.constant 0 : index
    %56 = vector.load %arg15[%c0_20, %c0_21] : memref<8x32xf32, #tpu.memory_space<vmem>>, vector<8x8xf32>
    tpu.vector_store %arg15[%c0_20, %c0_21], %55 {strides = array<i32>} : memref<8x32xf32, #tpu.memory_space<vmem>>, vector<8x8xf32>,
    %57 = vector.extract_strided_slice %35 {offsets = [0, 8], sizes = [8, 8], strides = [1, 1]} : vector<8x32xbf16> to vector<8x8xbf16>
    %58 = vector.extract_strided_slice %37 {offsets = [0, 8], sizes = [8, 8], strides = [1, 1]} : vector<8x32xbf16> to vector<8x8xbf16>
    %59 = vector.extract_strided_slice %39 {offsets = [0, 8], sizes = [8, 8], strides = [1, 1]} : vector<8x32xbf16> to vector<8x8xbf16>
    %cst_22 = arith.constant dense<0.000000e+00> : vector<8x8xf32>
    %60 = tpu.matmul %57, %58, %cst_22 {dimension_numbers = #tpu.dot_dimension_numbers<[1], [1], [0], [0], [0, 0, 1, 0], [], []>} : vector<8x8xbf16>, vector<8x8xbf16>, vector<8x8xf32> -> vector<8x8xf32>
    %cst_23 = arith.constant dense<0xFF800000> : vector<8xf32>
    %61 = vector.multi_reduction <maximumf>, %60, %cst_23 [1] : vector<8x8xf32> to vector<8xf32>
    %62 = vector.shape_cast %61 : vector<8xf32> to vector<8x1xf32>
    %63 = vector.broadcast %62 : vector<8x1xf32> to vector<8x8xf32>
    %64 = arith.subf %60, %63 : vector<8x8xf32>
    %65 = math.exp %64 : vector<8x8xf32>
    %cst_24 = arith.constant dense<0.000000e+00> : vector<8xf32>
    %66 = vector.multi_reduction <add>, %65, %cst_24 [1] : vector<8x8xf32> to vector<8xf32>
    %67 = vector.shape_cast %66 : vector<8xf32> to vector<8x1xf32>
    %68 = tpu.reciprocal %67 {approx = true} : vector<8x1xf32> -> vector<8x1xf32>
    %69 = vector.broadcast %68 : vector<8x1xf32> to vector<8x8xf32>
    %70 = arith.mulf %65, %69 : vector<8x8xf32>
    %71 = arith.truncf %70 : vector<8x8xf32> to vector<8x8xbf16>
    %cst_25 = arith.constant dense<0.000000e+00> : vector<8x8xf32>
    %72 = tpu.matmul %71, %59, %cst_25 {dimension_numbers = #tpu.dot_dimension_numbers<[1], [0], [0], [1], [0, 0, 1, 1], [], []>} : vector<8x8xbf16>, vector<8x8xbf16>, vector<8x8xf32> -> vector<8x8xf32>
    %c0_26 = arith.constant 0 : index
    %c8 = arith.constant 8 : index
    %73 = vector.load %arg15[%c0_26, %c8] : memref<8x32xf32, #tpu.memory_space<vmem>>, vector<8x8xf32>
    tpu.vector_store %arg15[%c0_26, %c8], %72 {strides = array<i32>} : memref<8x32xf32, #tpu.memory_space<vmem>>, vector<8x8xf32>,
    %74 = vector.extract_strided_slice %35 {offsets = [0, 16], sizes = [8, 8], strides = [1, 1]} : vector<8x32xbf16> to vector<8x8xbf16>
    %75 = vector.extract_strided_slice %37 {offsets = [0, 16], sizes = [8, 8], strides = [1, 1]} : vector<8x32xbf16> to vector<8x8xbf16>
    %76 = vector.extract_strided_slice %39 {offsets = [0, 16], sizes = [8, 8], strides = [1, 1]} : vector<8x32xbf16> to vector<8x8xbf16>
    %cst_27 = arith.constant dense<0.000000e+00> : vector<8x8xf32>
    %77 = tpu.matmul %74, %75, %cst_27 {dimension_numbers = #tpu.dot_dimension_numbers<[1], [1], [0], [0], [0, 0, 1, 0], [], []>} : vector<8x8xbf16>, vector<8x8xbf16>, vector<8x8xf32> -> vector<8x8xf32>
    %cst_28 = arith.constant dense<0xFF800000> : vector<8xf32>
    %78 = vector.multi_reduction <maximumf>, %77, %cst_28 [1] : vector<8x8xf32> to vector<8xf32>
    %79 = vector.shape_cast %78 : vector<8xf32> to vector<8x1xf32>
    %80 = vector.broadcast %79 : vector<8x1xf32> to vector<8x8xf32>
    %81 = arith.subf %77, %80 : vector<8x8xf32>
    %82 = math.exp %81 : vector<8x8xf32>
    %cst_29 = arith.constant dense<0.000000e+00> : vector<8xf32>
    %83 = vector.multi_reduction <add>, %82, %cst_29 [1] : vector<8x8xf32> to vector<8xf32>
    %84 = vector.shape_cast %83 : vector<8xf32> to vector<8x1xf32>
    %85 = tpu.reciprocal %84 {approx = true} : vector<8x1xf32> -> vector<8x1xf32>
    %86 = vector.broadcast %85 : vector<8x1xf32> to vector<8x8xf32>
    %87 = arith.mulf %82, %86 : vector<8x8xf32>
    %88 = arith.truncf %87 : vector<8x8xf32> to vector<8x8xbf16>
    %cst_30 = arith.constant dense<0.000000e+00> : vector<8x8xf32>
    %89 = tpu.matmul %88, %76, %cst_30 {dimension_numbers = #tpu.dot_dimension_numbers<[1], [0], [0], [1], [0, 0, 1, 1], [], []>} : vector<8x8xbf16>, vector<8x8xbf16>, vector<8x8xf32> -> vector<8x8xf32>
    %c0_31 = arith.constant 0 : index
    %c16 = arith.constant 16 : index
    %90 = vector.load %arg15[%c0_31, %c16] : memref<8x32xf32, #tpu.memory_space<vmem>>, vector<8x8xf32>
    tpu.vector_store %arg15[%c0_31, %c16], %89 {strides = array<i32>} : memref<8x32xf32, #tpu.memory_space<vmem>>, vector<8x8xf32>,
    %91 = vector.extract_strided_slice %35 {offsets = [0, 24], sizes = [8, 8], strides = [1, 1]} : vector<8x32xbf16> to vector<8x8xbf16>
    %92 = vector.extract_strided_slice %37 {offsets = [0, 24], sizes = [8, 8], strides = [1, 1]} : vector<8x32xbf16> to vector<8x8xbf16>
    %93 = vector.extract_strided_slice %39 {offsets = [0, 24], sizes = [8, 8], strides = [1, 1]} : vector<8x32xbf16> to vector<8x8xbf16>
    %cst_32 = arith.constant dense<0.000000e+00> : vector<8x8xf32>
    %94 = tpu.matmul %91, %92, %cst_32 {dimension_numbers = #tpu.dot_dimension_numbers<[1], [1], [0], [0], [0, 0, 1, 0], [], []>} : vector<8x8xbf16>, vector<8x8xbf16>, vector<8x8xf32> -> vector<8x8xf32>
    %cst_33 = arith.constant dense<0xFF800000> : vector<8xf32>
    %95 = vector.multi_reduction <maximumf>, %94, %cst_33 [1] : vector<8x8xf32> to vector<8xf32>
    %96 = vector.shape_cast %95 : vector<8xf32> to vector<8x1xf32>
    %97 = vector.broadcast %96 : vector<8x1xf32> to vector<8x8xf32>
    %98 = arith.subf %94, %97 : vector<8x8xf32>
    %99 = math.exp %98 : vector<8x8xf32>
    %cst_34 = arith.constant dense<0.000000e+00> : vector<8xf32>
    %100 = vector.multi_reduction <add>, %99, %cst_34 [1] : vector<8x8xf32> to vector<8xf32>
    %101 = vector.shape_cast %100 : vector<8xf32> to vector<8x1xf32>
    %102 = tpu.reciprocal %101 {approx = true} : vector<8x1xf32> -> vector<8x1xf32>
    %103 = vector.broadcast %102 : vector<8x1xf32> to vector<8x8xf32>
    %104 = arith.mulf %99, %103 : vector<8x8xf32>
    %105 = arith.truncf %104 : vector<8x8xf32> to vector<8x8xbf16>
    %cst_35 = arith.constant dense<0.000000e+00> : vector<8x8xf32>
    %106 = tpu.matmul %105, %93, %cst_35 {dimension_numbers = #tpu.dot_dimension_numbers<[1], [0], [0], [1], [0, 0, 1, 1], [], []>} : vector<8x8xbf16>, vector<8x8xbf16>, vector<8x8xf32> -> vector<8x8xf32>
    %c0_36 = arith.constant 0 : index
    %c24 = arith.constant 24 : index
    %107 = vector.load %arg15[%c0_36, %c24] : memref<8x32xf32, #tpu.memory_space<vmem>>, vector<8x8xf32>
    tpu.vector_store %arg15[%c0_36, %c24], %106 {strides = array<i32>} : memref<8x32xf32, #tpu.memory_space<vmem>>, vector<8x8xf32>,
    %c0_37 = arith.constant 0 : index
    %c0_38 = arith.constant 0 : index
    %108 = vector.load %arg15[%c0_37, %c0_38] : memref<8x32xf32, #tpu.memory_space<vmem>>, vector<8x32xf32>
    %109 = arith.truncf %108 : vector<8x32xf32> to vector<8x32xbf16>
    %c0_39 = arith.constant 0 : index
    %c0_40 = arith.constant 0 : index
    %110 = vector.load %arg4[%c0_39, %c0_40] : memref<32x32xbf16, #tpu.memory_space<vmem>>, vector<32x32xbf16>
    %cst_41 = arith.constant dense<0.000000e+00> : vector<8x32xf32>
    %111 = tpu.matmul %109, %110, %cst_41 {dimension_numbers = #tpu.dot_dimension_numbers<[1], [0], [0], [1], [0, 0, 1, 1], [], []>} : vector<8x32xbf16>, vector<32x32xbf16>, vector<8x32xf32> -> vector<8x32xf32>
    %c0_42 = arith.constant 0 : index
    %c0_43 = arith.constant 0 : index
    %112 = vector.load %arg5[%c0_42, %c0_43] : memref<1x32xf32, #tpu.memory_space<vmem>>, vector<1x32xf32>
    %113 = vector.broadcast %112 : vector<1x32xf32> to vector<8x32xf32>
    %114 = arith.addf %111, %113 : vector<8x32xf32>
    %115 = arith.addf %1, %114 : vector<8x32xf32>
    %c0_44 = arith.constant 0 : index
    %c0_45 = arith.constant 0 : index
    %116 = vector.load %arg8[%c0_44, %c0_45] : memref<1x32xf32, #tpu.memory_space<vmem>>, vector<1x32xf32>
    %c0_46 = arith.constant 0 : index
    %c0_47 = arith.constant 0 : index
    %117 = vector.load %arg9[%c0_46, %c0_47] : memref<1x32xf32, #tpu.memory_space<vmem>>, vector<1x32xf32>
    %cst_48 = arith.constant dense<0.000000e+00> : vector<8xf32>
    %118 = vector.multi_reduction <add>, %115, %cst_48 [1] : vector<8x32xf32> to vector<8xf32>
    %119 = vector.shape_cast %118 : vector<8xf32> to vector<8x1xf32>
    %cst_49 = arith.constant 3.200000e+01 : f32
    %120 = vector.broadcast %cst_49 : f32 to vector<8x1xf32>
    %121 = arith.divf %119, %120 : vector<8x1xf32>
    %122 = vector.broadcast %121 : vector<8x1xf32> to vector<8x32xf32>
    %123 = arith.subf %115, %122 : vector<8x32xf32>
    %124 = arith.mulf %123, %123 : vector<8x32xf32>
    %cst_50 = arith.constant dense<0.000000e+00> : vector<8xf32>
    %125 = vector.multi_reduction <add>, %124, %cst_50 [1] : vector<8x32xf32> to vector<8xf32>
    %126 = vector.shape_cast %125 : vector<8xf32> to vector<8x1xf32>
    %cst_51 = arith.constant 3.200000e+01 : f32
    %127 = vector.broadcast %cst_51 : f32 to vector<8x1xf32>
    %128 = arith.divf %126, %127 : vector<8x1xf32>
    %129 = vector.broadcast %121 : vector<8x1xf32> to vector<8x32xf32>
    %130 = arith.subf %115, %129 : vector<8x32xf32>
    %cst_52 = arith.constant 9.99999974E-6 : f32
    %131 = vector.broadcast %cst_52 : f32 to vector<8x1xf32>
    %132 = arith.addf %128, %131 : vector<8x1xf32>
    %133 = math.rsqrt %132 : vector<8x1xf32>
    %134 = vector.broadcast %133 : vector<8x1xf32> to vector<8x32xf32>
    %135 = arith.mulf %130, %134 : vector<8x32xf32>
    %136 = vector.broadcast %116 : vector<1x32xf32> to vector<8x32xf32>
    %137 = arith.mulf %135, %136 : vector<8x32xf32>
    %138 = vector.broadcast %117 : vector<1x32xf32> to vector<8x32xf32>
    %139 = arith.addf %137, %138 : vector<8x32xf32>
    %140 = arith.truncf %139 : vector<8x32xf32> to vector<8x32xbf16>
    %c0_53 = arith.constant 0 : index
    %c0_54 = arith.constant 0 : index
    %141 = vector.load %arg10[%c0_53, %c0_54] : memref<32x64xbf16, #tpu.memory_space<vmem>>, vector<32x64xbf16>
    %cst_55 = arith.constant dense<0.000000e+00> : vector<8x64xf32>
    %142 = tpu.matmul %140, %141, %cst_55 {dimension_numbers = #tpu.dot_dimension_numbers<[1], [0], [0], [1], [0, 0, 1, 1], [], []>} : vector<8x32xbf16>, vector<32x64xbf16>, vector<8x64xf32> -> vector<8x64xf32>
    %c0_56 = arith.constant 0 : index
    %c0_57 = arith.constant 0 : index
    %143 = vector.load %arg11[%c0_56, %c0_57] : memref<1x64xf32, #tpu.memory_space<vmem>>, vector<1x64xf32>
    %144 = vector.broadcast %143 : vector<1x64xf32> to vector<8x64xf32>
    %145 = arith.addf %142, %144 : vector<8x64xf32>
    %cst_58 = arith.constant 5.000000e-01 : f32
    %146 = vector.broadcast %cst_58 : f32 to vector<8x64xf32>
    %147 = arith.mulf %146, %145 : vector<8x64xf32>
    %cst_59 = arith.constant 0.707106769 : f32
    %148 = vector.broadcast %cst_59 : f32 to vector<8x64xf32>
    %149 = arith.mulf %145, %148 : vector<8x64xf32>
    %150 = math.absf %149 : vector<8x64xf32>
    %cst_60 = arith.constant 0.327591091 : f32
    %151 = vector.broadcast %cst_60 : f32 to vector<8x64xf32>
    %152 = arith.mulf %151, %150 : vector<8x64xf32>
    %cst_61 = arith.constant 1.000000e+00 : f32
    %153 = vector.broadcast %cst_61 : f32 to vector<8x64xf32>
    %154 = arith.addf %153, %152 : vector<8x64xf32>
    %cst_62 = arith.constant 1.000000e+00 : f32
    %155 = vector.broadcast %cst_62 : f32 to vector<8x64xf32>
    %156 = arith.divf %155, %154 : vector<8x64xf32>
    %cst_63 = arith.constant 1.06140542 : f32
    %157 = vector.broadcast %cst_63 : f32 to vector<8x64xf32>
    %158 = arith.mulf %157, %156 : vector<8x64xf32>
    %cst_64 = arith.constant -1.45315206 : f32
    %159 = vector.broadcast %cst_64 : f32 to vector<8x64xf32>
    %160 = arith.addf %158, %159 : vector<8x64xf32>
    %161 = arith.mulf %160, %156 : vector<8x64xf32>
    %cst_65 = arith.constant 1.42141378 : f32
    %162 = vector.broadcast %cst_65 : f32 to vector<8x64xf32>
    %163 = arith.addf %161, %162 : vector<8x64xf32>
    %164 = arith.mulf %163, %156 : vector<8x64xf32>
    %cst_66 = arith.constant -0.284496725 : f32
    %165 = vector.broadcast %cst_66 : f32 to vector<8x64xf32>
    %166 = arith.addf %164, %165 : vector<8x64xf32>
    %167 = arith.mulf %166, %156 : vector<8x64xf32>
    %cst_67 = arith.constant 0.254829586 : f32
    %168 = vector.broadcast %cst_67 : f32 to vector<8x64xf32>
    %169 = arith.addf %167, %168 : vector<8x64xf32>
    %170 = arith.mulf %169, %156 : vector<8x64xf32>
    %cst_68 = arith.constant 0.000000e+00 : f32
    %171 = vector.broadcast %cst_68 : f32 to vector<8x64xf32>
    %172 = arith.subf %171, %150 : vector<8x64xf32>
    %173 = arith.mulf %172, %150 : vector<8x64xf32>
    %174 = math.exp %173 : vector<8x64xf32>
    %175 = arith.mulf %170, %174 : vector<8x64xf32>
    %cst_69 = arith.constant 1.000000e+00 : f32
    %176 = vector.broadcast %cst_69 : f32 to vector<8x64xf32>
    %177 = arith.subf %176, %175 : vector<8x64xf32>
    %cst_70 = arith.constant 0.000000e+00 : f32
    %178 = vector.broadcast %cst_70 : f32 to vector<8x64xf32>
    %179 = arith.cmpf oge, %149, %178 : vector<8x64xf32>
    %cst_71 = arith.constant 0.000000e+00 : f32
    %180 = vector.broadcast %cst_71 : f32 to vector<8x64xf32>
    %181 = arith.subf %180, %177 : vector<8x64xf32>
    %182 = arith.select %179, %177, %181 : vector<8x64xi1>, vector<8x64xf32>
    %cst_72 = arith.constant 1.000000e+00 : f32
    %183 = vector.broadcast %cst_72 : f32 to vector<8x64xf32>
    %184 = arith.addf %183, %182 : vector<8x64xf32>
    %185 = arith.mulf %147, %184 : vector<8x64xf32>
    %186 = arith.truncf %185 : vector<8x64xf32> to vector<8x64xbf16>
    %c0_73 = arith.constant 0 : index
    %c0_74 = arith.constant 0 : index
    %187 = vector.load %arg12[%c0_73, %c0_74] : memref<64x32xbf16, #tpu.memory_space<vmem>>, vector<64x32xbf16>
    %cst_75 = arith.constant dense<0.000000e+00> : vector<8x32xf32>
    %188 = tpu.matmul %186, %187, %cst_75 {dimension_numbers = #tpu.dot_dimension_numbers<[1], [0], [0], [1], [0, 0, 1, 1], [], []>} : vector<8x64xbf16>, vector<64x32xbf16>, vector<8x32xf32> -> vector<8x32xf32>
    %c0_76 = arith.constant 0 : index
    %c0_77 = arith.constant 0 : index
    %189 = vector.load %arg13[%c0_76, %c0_77] : memref<1x32xf32, #tpu.memory_space<vmem>>, vector<1x32xf32>
    %190 = vector.broadcast %189 : vector<1x32xf32> to vector<8x32xf32>
    %191 = arith.addf %188, %190 : vector<8x32xf32>
    %192 = arith.addf %115, %191 : vector<8x32xf32>
    %c0_78 = arith.constant 0 : index
    %c0_79 = arith.constant 0 : index
    %c0_80 = arith.constant 0 : index
    %193 = vector.load %arg14[%c0_78, %c0_79, %c0_80] : memref<1x8x32xf32, #tpu.memory_space<vmem>>, vector<1x8x32xf32>
    %194 = vector.shape_cast %193 : vector<1x8x32xf32> to vector<8x32xf32>
    %195 = vector.shape_cast %192 : vector<8x32xf32> to vector<1x8x32xf32>
    tpu.vector_store %arg14[%c0_78, %c0_79, %c0_80], %195 {strides = array<i32>} : memref<1x8x32xf32, #tpu.memory_space<vmem>>, vector<1x8x32xf32>,
    return
  }
  func.func @transform_0(%arg0: i32) -> (i32, i32, i32) {
    %c0_i32 = arith.constant 0 : i32
    %c0_i32_0 = arith.constant 0 : i32
    %c0_i32_1 = arith.constant 0 : i32
    return %arg0, %c0_i32, %c0_i32_0 : i32, i32, i32
  }
  func.func @transform_1(%arg0: i32) -> (i32, i32) {
    %c0_i32 = arith.constant 0 : i32
    %c0_i32_0 = arith.constant 0 : i32
    %c0_i32_1 = arith.constant 0 : i32
    return %c0_i32, %c0_i32_0 : i32, i32
  }
  func.func @transform_2(%arg0: i32) -> (i32, i32) {
    %c0_i32 = arith.constant 0 : i32
    %c0_i32_0 = arith.constant 0 : i32
    %c0_i32_1 = arith.constant 0 : i32
    return %c0_i32, %c0_i32_0 : i32, i32
  }
  func.func @transform_3(%arg0: i32) -> (i32, i32) {
    %c0_i32 = arith.constant 0 : i32
    %c0_i32_0 = arith.constant 0 : i32
    %c0_i32_1 = arith.constant 0 : i32
    return %c0_i32, %c0_i32_0 : i32, i32
  }
  func.func @transform_4(%arg0: i32) -> (i32, i32) {
    %c0_i32 = arith.constant 0 : i32
    %c0_i32_0 = arith.constant 0 : i32
    %c0_i32_1 = arith.constant 0 : i32
    return %c0_i32, %c0_i32_0 : i32, i32
  }
  func.func @transform_5(%arg0: i32) -> (i32, i32) {
    %c0_i32 = arith.constant 0 : i32
    %c0_i32_0 = arith.constant 0 : i32
    %c0_i32_1 = arith.constant 0 : i32
    return %c0_i32, %c0_i32_0 : i32, i32
  }
  func.func @transform_6(%arg0: i32) -> (i32, i32) {
    %c0_i32 = arith.constant 0 : i32
    %c0_i32_0 = arith.constant 0 : i32
    %c0_i32_1 = arith.constant 0 : i32
    return %c0_i32, %c0_i32_0 : i32, i32
  }
  func.func @transform_7(%arg0: i32) -> (i32, i32) {
    %c0_i32 = arith.constant 0 : i32
    %c0_i32_0 = arith.constant 0 : i32
    %c0_i32_1 = arith.constant 0 : i32
    return %c0_i32, %c0_i32_0 : i32, i32
  }
  func.func @transform_8(%arg0: i32) -> (i32, i32) {
    %c0_i32 = arith.constant 0 : i32
    %c0_i32_0 = arith.constant 0 : i32
    %c0_i32_1 = arith.constant 0 : i32
    return %c0_i32, %c0_i32_0 : i32, i32
  }
  func.func @transform_9(%arg0: i32) -> (i32, i32) {
    %c0_i32 = arith.constant 0 : i32
    %c0_i32_0 = arith.constant 0 : i32
    %c0_i32_1 = arith.constant 0 : i32
    return %c0_i32, %c0_i32_0 : i32, i32
  }
  func.func @transform_10(%arg0: i32) -> (i32, i32) {
    %c0_i32 = arith.constant 0 : i32
    %c0_i32_0 = arith.constant 0 : i32
    %c0_i32_1 = arith.constant 0 : i32
    return %c0_i32, %c0_i32_0 : i32, i32
  }
  func.func @transform_11(%arg0: i32) -> (i32, i32) {
    %c0_i32 = arith.constant 0 : i32
    %c0_i32_0 = arith.constant 0 : i32
    %c0_i32_1 = arith.constant 0 : i32
    return %c0_i32, %c0_i32_0 : i32, i32
  }
  func.func @transform_12(%arg0: i32) -> (i32, i32) {
    %c0_i32 = arith.constant 0 : i32
    %c0_i32_0 = arith.constant 0 : i32
    %c0_i32_1 = arith.constant 0 : i32
    return %c0_i32, %c0_i32_0 : i32, i32
  }
  func.func @transform_13(%arg0: i32) -> (i32, i32, i32) {
    %c0_i32 = arith.constant 0 : i32
    %c0_i32_0 = arith.constant 0 : i32
    %c0_i32_1 = arith.constant 0 : i32
    return %arg0, %c0_i32, %c0_i32_0 : i32, i32, i32
  }
}

</mosaic_0001>

<bundles_post_ra>
// kernel: tpu_custom_call.1
= control target key start
LH: loop header
LB: loop body
LE: loop exit
PB: predicated region body
PF: predicated region fallthrough
CT: control target
= control target key end

     0   :  { %s2372_s0 = inlined_call_operand.vmem [shape: f32[2,8,32], index: 0, kind: input, shape index: {}]   ;;  %s2373_s1 = inlined_call_operand.vmem [shape: bf16[32,96], index: 1, kind: input, shape index: {}]   ;;  %s2374_s2 = inlined_call_operand.vmem [shape: f32[1,96], index: 2, kind: input, shape index: {}]   ;;  %s2375_s3 = inlined_call_operand.vmem [shape: bf16[32,32], index: 3, kind: input, shape index: {}]   ;;  %s2376_s4 = inlined_call_operand.vmem [shape: f32[1,32], index: 4, kind: input, shape index: {}]   ;;  %s2377_s5 = inlined_call_operand.hbm [shape: f32[1,32], index: 5, kind: input, shape index: {}]   ;;  %s2378_s6 = inlined_call_operand.hbm [shape: f32[1,32], index: 6, kind: input, shape index: {}]   ;;  %s2379_s7 = inlined_call_operand.hbm [shape: f32[1,32], index: 7, kind: input, shape index: {}]   ;;  %s2380_s8 = inlined_call_operand.hbm [shape: f32[1,32], index: 8, kind: input, shape index: {}]   ;;  %s2381_s9 = inlined_call_operand.vmem [shape: bf16[32,64], index: 9, kind: input, shape index: {}]   ;;  %s2382_s10 = inlined_call_operand.vmem [shape: f32[1,64], index: 10, kind: input, shape index: {}]   ;;  %s2383_s11 = inlined_call_operand.vmem [shape: bf16[64,32], index: 11, kind: input, shape index: {}]   ;;  %s2384_s12 = inlined_call_operand.vmem [shape: f32[1,32], index: 12, kind: input, shape index: {}]   ;;  %s2385_s13 = inlined_call_operand.hbm [shape: f32[2,8,32], index: 13, kind: output, shape index: {}]  }
   0x1   :  { %2396 = sst [smem:[#allocation22_spill]] %s2385_s13 }
   0x2   :  { %18 = vsyncpa [#allocation4], 0 }
   0x3   :  { %19 = vsyncpa [#allocation7], 0 }
   0x4   :  { %20 = vsyncpa [#allocation10], 0 }
   0x5   :  { %21 = vsyncpa [#allocation5], 0 }
   0x6   :  { %23 = vsyncpa [#allocation5 + $0x1], 0  ;;  %s2014_s25 = smov 0   ;;  %s2016_s26 = smov 0  }
   0x7   :  { %s2018_s27 = smov 0   ;;  %s2020_s28 = smov 0  }
   0x8 LB: > { %2397 = sst [smem:[#allocation16_spill]] %s1909_s25  ;;  %s2035_s29 = sadd.s32 4294967295, %s1921_s28   ;;  %s1921_s28 = sphi %s2020_s28, %s2421_s28   ;;  %s1917_s27 = sphi %s2018_s27, %s2423_s27   ;;  %s1913_s26 = sphi %s2016_s26, %s2425_s26   ;;  %s1909_s25 = sphi %s2014_s25, %s2424_s25  }
   0x9   : > { %2398 = sst [smem:[#allocation17_spill]] %s1917_s27  ;;  %s1443_s30 = sadd.s32 4294967294, %s1921_s28  }
   0xa   : > { %2399 = sst [smem:[#allocation18_spill]] %s1921_s28  ;;  %s2039_s14 = sadd.s32 1, %s1921_s28  }
   0xb   : > { %2400 = sst [smem:[#allocation19_spill]] %s2039_s14  ;;  %s314_s15 = sadd.s32 1, %s1917_s27 }
   0xc   : > { %s311_s16 = ssub.s32 %s1921_s28, %s2039_s14  ;;  %p324_p0 = scmp.ne.s32.totalorder %s1917_s27, %s1913_s26 }
   0xd   : > { %p312_p1 = scmp.eq.s32.totalorder %s311_s16, 0  ;;  %p325_p2 = scmp.eq.s32.totalorder %s2035_s29, 1 }
   0xe   : > { %p330_p3 = scmp.ne.s32.totalorder %s1913_s26, %s1909_s25  ;;  %p331_p4 = scmp.eq.s32.totalorder %s1443_s30, 1 }
   0xf   : > { %s2050_s17 = scalar_select %p312_p1, %s1917_s27, %s314_s15  }
  0x10   : > { %p2052_p5 = por %p325_p2, %p324_p0  ;;  %p2056_p6 = por %p331_p4, %p330_p3 }
  0x11   : > { %2401 = sst [smem:[#allocation20_spill]] %s2050_s17  ;;  %p1444_p7 = scmp.ge.s32.totalorder %s1921_s28, 1 }
  0x12   : > { %s2402_s18 = scalar_select %p2052_p5, 1, 0 }
  0x13   : > { %s2403_s19 = scalar_select %p2056_p6, 1, 0 }
  0x14   : > { %p338_p8 = scmp.lt.s32.totalorder %s1921_s28, 3  ;;  %p2391_p9 = scmp.eq.s32.totalorder %s2035_s29, 0 }
  0x15   : > { %2404 = sst [smem:[#allocation21_spill]] %s2403_s19  ;;  %s1923_s21 = smov [#allocation6]  }
  0x16   : > { %p2063_p10 = pnand %p1444_p7, %p338_p8  ;;  %s374_s22 = sshll.u32 %s1923_s21, 4  ;;  %s375_s22 = int_to_ptr.vmem [resolvable:$true] %s374_s22 }
  0x17   : > { %s1924_s23 = smov [#allocation3]   ;;  %s1925_s15 = smov [#allocation8]  }
  0x18   : > { %s2405_s20 = scalar_select %p2063_p10, 1, 0 }
  0x19   : > { %p1623_p11 = pneg %p2063_p10  ;;  %s363_s24 = sshll.u32 %s1924_s23, 4  ;;  %s2075_s24 = int_to_ptr.vmem [resolvable:$true] %s363_s24 }
  0x1a   : > { %s385_s16 = sshll.u32 %s1925_s15, 4  ;;  %s1735_s21 = scalar_lea.hbm %s2378_s6, 16  ;;  %s2077_s16 = int_to_ptr.vmem [resolvable:$true] %s385_s16 }
  0x1b   : > { %p2071_p12 = pnand %p2391_p9, %p1623_p11  ;;  %p1736_p13 = scmp.ne.s32.totalorder %s2378_s6, %s1735_s21 }
  0x1c   : > { %p1742_p3 = scmp.lt.u32.totalorder %s1735_s21, %s2378_s6 }
  0x1d   : > { %p2087_p0 = pneg %p2071_p12 }
  0x1f   : > { %p1738_p1 = pnand %p2087_p0, %p1736_p13 }
  0x21   : > { %p1739_p2 = pneg %p1738_p1 }
  0x23   : > { %p1744_p4 = pnand %p1742_p3, %p1739_p2 }
  0x25   : > { %1747 = shalt.err (!%p1744_p4)
}
  0x26   : > { %s1748_s27 = scalar_lea.vmem %s375_s22, 16  ;;  %s1755_s14 = scalar_lea.vmem %s375_s22, 32 }
  0x27   : > { %p1749_p7 = scmp.ne.s32.totalorder %s375_s22, %s1748_s27  ;;  %p1756_p9 = scmp.lt.s32.totalorder %s375_s22, %s375_s22 }
  0x28   : > { %p1757_p6 = scmp.lt.s32.totalorder %s1755_s14, %s1748_s27 }
  0x29   : > { %p1751_p8 = pnand %p1749_p7, %p2087_p0 }
  0x2a   : > { %p1758_p5 = por %p1757_p6, %p1756_p9 }
  0x2b   : > { %p1752_p11 = pneg %p1751_p8 }
  0x2d   : > { %p1759_p10 = pnand %p1758_p5, %p1752_p11 }
  0x2f   : > { %1762 = shalt.err (!%p1759_p10)
}
  0x30   : > { %1629 = dma.hbm_to_vmem [thread:$0]  (!%p2071_p12), %s2378_s6, 16, %s375_s22, [#allocation7]  }
  0x31   : > { %s1763_s15 = scalar_lea.hbm %s2377_s5, 16 }
  0x32   : > { %p1764_p13 = scmp.ne.s32.totalorder %s2377_s5, %s1763_s15  ;;  %p1770_p5 = scmp.lt.u32.totalorder %s1763_s15, %s2377_s5 }
  0x34   : > { %p1766_p1 = pnand %p1764_p13, %p2087_p0 }
  0x36   : > { %p1767_p6 = pneg %p1766_p1 }
  0x38   : > { %p1772_p9 = pnand %p1770_p5, %p1767_p6 }
  0x3a   : > { %1775 = shalt.err (!%p1772_p9)
}
  0x3b   : > { %s1776_s22 = scalar_lea.vmem %s2075_s24, 16  ;;  %s1783_s13 = scalar_lea.vmem %s2075_s24, 32 }
  0x3c   : > { %p1777_p10 = scmp.ne.s32.totalorder %s2075_s24, %s1776_s22  ;;  %p1784_p4 = scmp.lt.s32.totalorder %s2075_s24, %s2075_s24 }
  0x3d   : > { %p1785_p7 = scmp.lt.s32.totalorder %s1783_s13, %s1776_s22 }
  0x3e   : > { %p1779_p2 = pnand %p1777_p10, %p2087_p0 }
  0x3f   : > { %p1786_p8 = por %p1785_p7, %p1784_p4 }
  0x40   : > { %p1780_p3 = pneg %p1779_p2 }
  0x42   : > { %p1787_p11 = pnand %p1786_p8, %p1780_p3 }
  0x44   : > { %1790 = shalt.err (!%p1787_p11)
}
  0x45   : > { %1626 = dma.hbm_to_vmem [thread:$0]  (!%p2071_p12), %s2377_s5, 16, %s2075_s24, [#allocation4]  }
  0x46   : > { %s1791_s21 = scalar_lea.hbm %s2379_s7, 16 }
  0x47   : > { %p1792_p13 = scmp.ne.s32.totalorder %s2379_s7, %s1791_s21  ;;  %p1798_p5 = scmp.lt.u32.totalorder %s1791_s21, %s2379_s7 }
  0x49   : > { %p1794_p1 = pnand %p1792_p13, %p2087_p0 }
  0x4b   : > { %p1795_p6 = pneg %p1794_p1 }
  0x4d   : > { %p1800_p9 = pnand %p1798_p5, %p1795_p6 }
  0x4f   : > { %1803 = shalt.err (!%p1800_p9)
}
  0x50   : > { %s1804_s24 = scalar_lea.vmem %s2077_s16, 16  ;;  %s1811_s13 = scalar_lea.vmem %s2077_s16, 32 }
  0x51   : > { %p1805_p10 = scmp.ne.s32.totalorder %s2077_s16, %s1804_s24  ;;  %p1812_p4 = scmp.lt.s32.totalorder %s2077_s16, %s2077_s16 }
  0x52   : > { %p1813_p7 = scmp.lt.s32.totalorder %s1811_s13, %s1804_s24 }
  0x53   : > { %p1807_p2 = pnand %p1805_p10, %p2087_p0 }
  0x54   : > { %p1814_p8 = por %p1813_p7, %p1812_p4 }
  0x55   : > { %p1808_p3 = pneg %p1807_p2 }
  0x57   : > { %p1815_p11 = pnand %p1814_p8, %p1808_p3 }
  0x59   : > { %1818 = shalt.err (!%p1815_p11)
}
  0x5a   : > { %1632 = dma.hbm_to_vmem [thread:$0]  (!%p2071_p12), %s2379_s7, 16, %s2077_s16, [#allocation7]  }
  0x5b   : > { %s1926_s19 = smov [#allocation9]   ;;  %s1819_s27 = scalar_lea.hbm %s2380_s8, 16 }
  0x5c   : > { %s396_s25 = sshll.u32 %s1926_s19, 4  ;;  %p1820_p13 = scmp.ne.s32.totalorder %s2380_s8, %s1819_s27  ;;  %s397_s25 = int_to_ptr.vmem [resolvable:$true] %s396_s25 }
  0x5d   : > { %p1826_p5 = scmp.lt.u32.totalorder %s1819_s27, %s2380_s8 }
  0x5e   : > { %p1822_p1 = pnand %p1820_p13, %p2087_p0 }
  0x60   : > { %p1823_p6 = pneg %p1822_p1 }
  0x62   : > { %p1828_p9 = pnand %p1826_p5, %p1823_p6 }
  0x64   : > { %1831 = shalt.err (!%p1828_p9)
}
  0x65   : > { %s1832_s16 = scalar_lea.vmem %s397_s25, 16  ;;  %s1839_s28 = scalar_lea.vmem %s397_s25, 32 }
  0x66   : > { %p1833_p10 = scmp.ne.s32.totalorder %s397_s25, %s1832_s16  ;;  %p1840_p4 = scmp.lt.s32.totalorder %s397_s25, %s397_s25 }
  0x67   : > { %p1841_p7 = scmp.lt.s32.totalorder %s1839_s28, %s1832_s16 }
  0x68   : > { %p1835_p2 = pnand %p1833_p10, %p2087_p0 }
  0x69   : > { %p1842_p8 = por %p1841_p7, %p1840_p4 }
  0x6a   : > { %p1836_p3 = pneg %p1835_p2 }
  0x6c   : > { %p1843_p11 = pnand %p1842_p8, %p1836_p3 }
  0x6e   : > { %1846 = shalt.err (!%p1843_p11)
}
  0x6f   : > { %1635 = dma.hbm_to_vmem [thread:$0]  (!%p2071_p12), %s2380_s8, 16, %s397_s25, [#allocation10]  }
  0x70   : > { %p2408_p13 = scmp.ne.s32.totalorder %s2405_s20, 0 }
  0x71   : > { %p2409_p1 = scmp.eq.s32.totalorder (!%p2408_p13), %s2035_s29, 0 }
  0x72   : > { %428 = sbr.rel (%p2408_p13) target bundleno = 2741 (0xab5), region = 72 }
  0x79   : > { %1892 = dma.done.wait (%p2409_p1), [#allocation4], 16   ;;  %p2410_p0 = pmov %p2409_p1 }
  0x7b   : > { %1894 = vsyncadd (%p2410_p0), [#allocation4], 4294967280  ;;  %p2411_p6 = pmov %p2410_p0 }
  0x7c   : > { %p2412_p5 = pmov %p2410_p0 }
  0x7d   : > { %1896 = dma.done.wait (%p2411_p6), [#allocation7], 32  }
  0x7e   : > { %1898 = vsyncadd (%p2412_p5), [#allocation7], 4294967264  ;;  %p2413_p9 = pmov %p2410_p0 }
  0x7f   : > { %p2414_p12 = pmov %p2410_p0 }
  0x80   : > { %1900 = dma.done.wait (%p2413_p9), [#allocation10], 16  }
  0x81   : > { %1902 = vsyncadd (%p2414_p12), [#allocation10], 4294967280  ;;  %p483_p10 = scmp.lt.s32.totalorder %s2035_s29, 1  ;;  %vm491_vm0 = vcmask 261120   ;;  %v1701_v7 = vld [vmem:[%s2373_s1] sm:$0xff]   ;;  %v1927_v8 = vmov 0.0  }
  0x82   : > { %1521 = vmatprep.subr.bf16.mxu0 %v1927_v8  ;;  %vm1928_vm1 = vmmov 0   ;;  %v1702_v9 = vld [vmem:[%s2373_s1 + $0x8] sm:$0xff]   ;;  %1529 = vmatprep.subr.bf16.mxu1 %v1927_v8  ;;  %v1459_v20 = vld [vmem:[%s2374_s2] ss:$0 sm:$0xff]  ;;  %s1929_s16 = smov 96   ;;  %s1930_s28 = smov 120  }
  0x83   : > { %s484_s20 = scalar_select %p483_p10, %s2035_s29, 1  ;;  %1525 = vmatprep.mubr.msk.bf16.mxu0 %vm1928_vm1, %v1927_v8  ;;  %1522 = vmatpush3.bf16.msra.mxu0 %v1701_v7  ;;  %v1457_v14 = vld [vmem:[#allocation3] ss:$0 sm:$0xff]  ;;  %v1458_v16 = vld [vmem:[#allocation6] ss:$0 sm:$0xff]  ;;  %vm593_vm2 = vcmask 64512  }
  0x84   : > { %1523 = vmatprep.subr.bf16.mxu0 %v1927_v8  ;;  %1531 = vmatprep.mubr.msk.bf16.mxu1 %vm1928_vm1, %v1927_v8  ;;  %s1931_s17 = smov 88   ;;  %s1932_s19 = smov 80   ;;  %vm657_vm3 = vcmask 1043456   ;;  %vm817_vm4 = vcmask 130112   ;;  %vm933_vm5 = vcmask 195712   ;;  %vm1049_vm6 = vcmask 261312  }
  0x85   : > { %s1456_s30 = sshll.u32 %s484_s20, 3  ;;  %s1933_s20 = smov 112   ;;  %vm1283_vm8 = vcmask 523264  }
  0x86   : > { %s486_s21 = scalar_lea.vmem %s2372_s0, %s1456_s30  ;;  %s1934_s30 = smov 72  }
  0x87   : > { %v2188_v0 = vld [vmem:[%s486_s21] sm:$0xff]  ;;  %1524 = vmatpush3.bf16.msra.mxu0 %v1702_v9  ;;  %s1935_s23 = smov 104   ;;  %s1936_s25 = smov 64  }
  0x88   : > { %v492_v1 = vsel %vm491_vm0, %v2188_v0, 0.0  ;;  %1535 = vmatprep.subr.bf16.mxu0 %v1927_v8  ;;  %s1937_s21 = smov 56   ;;  %s1938_s15 = smov 48  }
  0x89   : > { %493 = vadd.xlane.f32.xlu0 %v492_v1  ;;  %s1939_s27 = smov 40   ;;  %s1940_s14 = smov 8  }
  0x8a   : > { %s2415_s24 = sld [smem:[#allocation22_spill]]  ;;  %p2416_p3 = scmp.ne.s32.totalorder %s2402_s18, 0 }
 0x116   : > { %v494_v2 = vpop.xlane.xlu0 %493 }
 0x117   : > { %v496_v3 = vmul.f32 0.03125, %v494_v2 }
 0x119   : > { %v497_v4 = vsub.f32 %v2188_v0, %v496_v3 }
 0x11b   : > { %v498_v5 = vmul.f32 %v497_v4, %v497_v4 }
 0x11d   : > { %v499_v6 = vsel %vm491_vm0, %v498_v5, 0.0 }
 0x11e   : > { %500 = vadd.xlane.f32.xlu0 %v499_v6 }
 0x1ab   : > { %v501_v10 = vpop.xlane.xlu0 %500 }
 0x1ac   : > { %v502_v11 = vmul.f32 0.03125, %v501_v10 }
 0x1ae   : > { %v503_v12 = vadd.f32 1e-05, %v502_v11 }
 0x1b0   : > { %1711 = vrsqrt.f32 %v503_v12 }
 0x1ba   : > { %v1712_v13 = vpop.eup %1711 }
 0x1bb   : > { %v505_v15 = vmul.f32 %v1712_v13, %v497_v4 }
 0x1bd   : > { %v512_v17 = vmul.f32 %v1457_v14, %v505_v15 }
 0x1bf   : > { %v519_v18 = vadd.f32 %v1458_v16, %v512_v17 }
 0x1c1   : > { %v520_v19 = vpack.c.bf16 %v519_v18, %v519_v18 }
 0x1c3   : > { %1526 = vmatmul.mubr.msk.bf16.vlgmr.msra.gmra.mrb[0].mxu0 %vm491_vm0, %v520_v19 }
 0x1c4   : > { %1537 = vmatprep.mubr.msk.bf16.mxu0 %vm1928_vm1, %v1927_v8 }
 0x296   : > { %v581_v21 = vpop.f32.mrb[0].mxu0 }
 0x297   : > { %v582_v22 = vadd.f32 %v1459_v20, %v581_v21  ;;  %v1527_v23 = vpop.f32.mrb[1].mxu0 }
 0x298   : > { %v584_v24 = vpop.f32.mrb[2].mxu0 }
 0x299   : > { %v587_v25 = vmul.f32 0.35355338, %v582_v22  ;;  %v2214_v26 = vpack.c.bf16 %v582_v22, %v582_v22  ;;  %v1528_v27 = vpop.f32.mrb[3].mxu0 }
 0x29b   : > { %v588_v28 = vpack.c.bf16 %v587_v25, %v587_v25  ;;  %591 = vrot.lane.b32.xlu1 %v2214_v26, %s1929_s16 }
 0x29d   : > { %703 = vrot.lane.b32.xlu0 %v588_v28, %s1930_s28  ;;  %s1941_s28 = smov 16  }
 0x29f   : > { %705 = vrot.lane.b32.xlu1 %v2214_v26, %s1931_s17  ;;  %s1942_s17 = smov 24  }
 0x2a3   : > { %821 = vrot.lane.b32.xlu1 %v2214_v26, %s1932_s19 }
 0x2a7   : > { %819 = vrot.lane.b32.xlu1 %v588_v28, %s1933_s20  ;;  %s480_s20 = sand.u32 1, %s1913_s26  }
 0x2ab   : > { %937 = vrot.lane.b32.xlu1 %v2214_v26, %s1934_s30  ;;  %s1455_s30 = sshll.u32 %s480_s20, 3 }
 0x2af   : > { %935 = vrot.lane.b32.xlu1 %v588_v28, %s1935_s23 }
 0x30d   : > { %v592_v29 = vpop.permute.xlu1 %591 }
 0x30e   : > { %v598_v30 = vsel %vm593_vm2, %v592_v29, 0 }
 0x30f   : > { %1530 = vmatpush3.bf16.xpose.msra.mxu1 %v598_v30  ;;  %v704_v34 = vpop.permute.xlu0 %703 }
 0x310   : > { %1541 = vmatprep.subr.bf16.mxu1 %v1927_v8 }
 0x311   : > { %v706_v31 = vpop.permute.xlu1 %705 }
 0x312   : > { %v711_v32 = vsel %vm593_vm2, %v706_v31, 0 }
 0x315   : > { %v822_v33 = vpop.permute.xlu1 %821 }
 0x316   : > { %1532 = vmatmul.mubr.msk.bf16.vlgmr.msra.gmra.mrb[0].mxu1 %vm593_vm2, %v588_v28  ;;  %v827_v36 = vsel %vm593_vm2, %v822_v33, 0 }
 0x317   : > { %1542 = vmatpush3.bf16.xpose.msra.mxu1 %v711_v32  ;;  %1543 = vmatprep.mubr.msk.bf16.mxu1 %vm1928_vm1, %v1927_v8 }
 0x318   : > { %1553 = vmatprep.subr.bf16.mxu1 %v1927_v8 }
 0x319   : > { %v820_v35 = vpop.permute.xlu1 %819 }
 0x31d   : > { %v938_v37 = vpop.permute.xlu1 %937 }
 0x31e   : > { %1544 = vmatmul.mubr.msk.bf16.vlgmr.msra.gmra.mrb[4].mxu1 %vm593_vm2, %v704_v34  ;;  %v943_v38 = vsel %vm593_vm2, %v938_v37, 0 }
 0x31f   : > { %1554 = vmatpush3.bf16.xpose.msra.mxu1 %v827_v36  ;;  %1555 = vmatprep.mubr.msk.bf16.mxu1 %vm1928_vm1, %v1927_v8 }
 0x320   : > { %1565 = vmatprep.subr.bf16.mxu1 %v1927_v8 }
 0x321   : > { %v936_v39 = vpop.permute.xlu1 %935 }
 0x326   : > { %1556 = vmatmul.mubr.msk.bf16.vlgmr.msra.gmra.mrb[8].mxu1 %vm593_vm2, %v820_v35 }
 0x327   : > { %1566 = vmatpush3.bf16.xpose.msra.mxu1 %v943_v38  ;;  %1567 = vmatprep.mubr.msk.bf16.mxu1 %vm1928_vm1, %v1927_v8 }
 0x328   : > { %1577 = vmatprep.subr.bf16.mxu1 %v1927_v8 }
 0x32e   : > { %1568 = vmatmul.mubr.msk.bf16.vlgmr.msra.gmra.mrb[12].mxu1 %vm593_vm2, %v936_v39 }
 0x32f   : > { %1581 = vmatprep.mubr.msk.bf16.mxu1 %vm1928_vm1, %v1927_v8 }
 0x3e9   : > { %v634_v40 = vpop.f32.mrb[0].mxu1 }
 0x3ea   : > { %v1533_v41 = vpop.f32.mrb[1].mxu1  ;;  %v640_v42 = vsel %vm593_vm2, %v634_v40, -inf }
 0x3eb   : > { %641 = vmax.xlane.f32.xlu1 %v640_v42  ;;  %v637_v43 = vpop.f32.mrb[2].mxu1 }
 0x3ec   : > { %v1534_v44 = vpop.f32.mrb[3].mxu1 }
 0x3f1   : > { %v747_v45 = vpop.f32.mrb[4].mxu1 }
 0x3f2   : > { %v1545_v46 = vpop.f32.mrb[5].mxu1  ;;  %v753_v47 = vsel %vm593_vm2, %v747_v45, -inf }
 0x3f3   : > { %754 = vmax.xlane.f32.xlu0 %v753_v47  ;;  %v750_v48 = vpop.f32.mrb[6].mxu1 }
 0x3f4   : > { %v1546_v49 = vpop.f32.mrb[7].mxu1 }
 0x3f9   : > { %v863_v50 = vpop.f32.mrb[8].mxu1 }
 0x3fa   : > { %v1557_v51 = vpop.f32.mrb[9].mxu1  ;;  %v869_v52 = vsel %vm593_vm2, %v863_v50, -inf }
 0x3fb   : > { %870 = vmax.xlane.f32.xlu1 %v869_v52  ;;  %v866_v53 = vpop.f32.mrb[10].mxu1  ;;  %v1704_v51 = vld [vmem:[%s2375_s3 + $0x8] sm:$0xff]  }
 0x3fc   : > { %v1558_v54 = vpop.f32.mrb[11].mxu1 }
 0x401   : > { %v979_v55 = vpop.f32.mrb[12].mxu1 }
 0x402   : > { %v1569_v56 = vpop.f32.mrb[13].mxu1  ;;  %v985_v57 = vsel %vm593_vm2, %v979_v55, -inf }
 0x403   : > { %986 = vmax.xlane.f32.xlu0 %v985_v57  ;;  %v982_v58 = vpop.f32.mrb[14].mxu1 }
 0x404   : > { %v1570_v59 = vpop.f32.mrb[15].mxu1 }
 0x478   : > { %v642_v60 = vpop.xlane.xlu1 %641 }
 0x479   : > { %v643_v61 = vsub.f32 %v634_v40, %v642_v60 }
 0x47b   : > { %v644_v62 = vmul.f32 1.442695, %v643_v61 }
 0x47d   : > { %1713 = vpow2.f32 %v644_v62 }
 0x480   : > { %v755_v63 = vpop.xlane.xlu0 %754 }
 0x481   : > { %v756_v1 = vsub.f32 %v747_v45, %v755_v63 }
 0x483   : > { %v757_v2 = vmul.f32 1.442695, %v756_v1 }
 0x485   : > { %1715 = vpow2.f32 %v757_v2  ;;  %v1471_v2 = vld [vmem:[%s2376_s4] ss:$0 sm:$0xff] }
 0x487   : > { %v1714_v3 = vpop.eup %1713 }
 0x488   : > { %v646_v4 = vsel %vm593_vm2, %v1714_v3, 0.0  ;;  %v871_v13 = vpop.xlane.xlu1 %870 }
 0x489   : > { %647 = vadd.xlane.f32.xlu1 %v646_v4  ;;  %v872_v14 = vsub.f32 %v863_v50, %v871_v13  ;;  %v1703_v50 = vld [vmem:[%s2375_s3] sm:$0xff]  }
 0x48a   : > { %1578 = vmatpush3.bf16.msra.mxu1 %v1703_v50 }
 0x48b   : > { %v873_v15 = vmul.f32 1.442695, %v872_v14  ;;  %1579 = vmatprep.subr.bf16.mxu1 %v1927_v8 }
 0x48e   : > { %1580 = vmatpush3.bf16.msra.mxu1 %v1704_v51 }
 0x48f   : > { %v1716_v5 = vpop.eup %1715  ;;  %1593 = vmatprep.subr.bf16.mxu1 %v1927_v8 }
 0x490   : > { %v987_v6 = vpop.xlane.xlu0 %986  ;;  %v759_v7 = vsel %vm593_vm2, %v1716_v5, 0.0 }
 0x491   : > { %v988_v9 = vsub.f32 %v979_v55, %v987_v6  ;;  %760 = vadd.xlane.f32.xlu0 %v759_v7 }
 0x493   : > { %v989_v10 = vmul.f32 1.442695, %v988_v9 }
 0x495   : > { %1717 = vpow2.f32 %v989_v10 }
 0x496   : > { %1719 = vpow2.f32 %v873_v15 }
 0x49a   : > { %652 = vrot.lane.b32.xlu1 %v2214_v26, %s1936_s25 }
 0x49f   : > { %v1718_v11 = vpop.eup %1717 }
 0x4a0   : > { %v991_v12 = vsel %vm593_vm2, %v1718_v11, 0.0  ;;  %v1720_v16 = vpop.eup %1719 }
 0x4a1   : > { %992 = vadd.xlane.f32.xlu0 %v991_v12  ;;  %v875_v17 = vsel %vm593_vm2, %v1720_v16, 0.0 }
 0x4b7   : > { %765 = vrot.lane.b32.xlu0 %v2214_v26, %s1937_s21  ;;  %s1488_s21 = sshll.u32 %s2035_s29, 7  ;;  %s1330_s29 = scalar_lea.sflag [#allocation5], %s480_s20 }
 0x4b8   : > { %s2329_s13 = scalar_lea.hbm %s2415_s24, %s1488_s21 }
 0x4be   : > { %876 = vadd.xlane.f32.xlu1 %v875_v17 }
 0x4cf   : > { %881 = vrot.lane.b32.xlu1 %v2214_v26, %s1938_s15  ;;  %s482_s15 = scalar_lea.vmem [#allocation11], %s1455_s30 }
 0x4d3   : > { %997 = vrot.lane.b32.xlu1 %v2214_v26, %s1939_s27  ;;  %s1343_s27 = sshll.u32 %s482_s15, 4  ;;  %s2331_s27 = int_to_ptr.vmem [resolvable:$true] %s1343_s27 }
 0x4d4   : > { %s1847_s16 = scalar_lea.vmem %s2331_s27, 128 }
 0x4d5   : > { %p1848_p2 = scmp.ne.s32.totalorder %s2331_s27, %s1847_s16 }
 0x4d7   : > { %p1849_p4 = pnand %p1848_p2, %p2416_p3 }
 0x4d9   : > { %p1850_p7 = pneg %p1849_p4 }
 0x516   : > { %v648_v18 = vpop.xlane.xlu1 %647 }
 0x517   : > { %1721 = vrcp.f32 %v648_v18 }
 0x51a   : > { %v653_v19 = vpop.permute.xlu1 %652 }
 0x51b   : > { %v659_v20 = vsel %vm657_vm3, %v653_v19, 0 }
 0x51c   : > { %1536 = vmatpush3.bf16.msra.mxu0 %v659_v20 }
 0x51d   : > { %1547 = vmatprep.subr.bf16.mxu0 %v1927_v8 }
 0x51e   : > { %v761_v22 = vpop.xlane.xlu0 %760 }
 0x51f   : > { %1723 = vrcp.f32 %v761_v22 }
 0x521   : > { %v1722_v21 = vpop.eup %1721 }
 0x522   : > { %v650_v23 = vmul.f32 %v1722_v21, %v1714_v3  ;;  %v1475_v21 = vld [vmem:[#allocation8] ss:$0 sm:$0xff] }
 0x524   : > { %v651_v24 = vpack.c.bf16 %v650_v23, %v650_v23  ;;  %v1476_v23 = vld [vmem:[#allocation9] ss:$0 sm:$0xff] }
 0x526   : > { %1538 = vmatmul.mubr.msk.bf16.vlgmr.msra.gmra.mrb[4].mxu0 %vm593_vm2, %v651_v24 }
 0x527   : > { %1549 = vmatprep.mubr.msk.bf16.mxu0 %vm1928_vm1, %v1927_v8 }
 0x529   : > { %v1724_v25 = vpop.eup %1723 }
 0x52a   : > { %v763_v27 = vmul.f32 %v1724_v25, %v1716_v5 }
 0x52c   : > { %v764_v30 = vpack.c.bf16 %v763_v27, %v763_v27  ;;  %v1707_v27 = vld [vmem:[%s2383_s11] sm:$0xff]  }
 0x52e   : > { %v993_v26 = vpop.xlane.xlu0 %992 }
 0x532   : > { %v766_v28 = vpop.permute.xlu0 %765 }
 0x533   : > { %v771_v29 = vsel %vm657_vm3, %v766_v28, 0  ;;  %v1708_v28 = vld [vmem:[%s2383_s11 + $0x8] sm:$0xff]  }
 0x534   : > { %1548 = vmatpush3.bf16.msra.mxu0 %v771_v29  ;;  %v1709_v29 = vld [vmem:[%s2383_s11 + $0x10] sm:$0xff]  }
 0x535   : > { %1559 = vmatprep.subr.bf16.mxu0 %v1927_v8 }
 0x537   : > { %1550 = vmatmul.mubr.msk.bf16.vlgmr.msra.gmra.mrb[8].mxu0 %vm593_vm2, %v764_v30  ;;  %v1710_v30 = vld [vmem:[%s2383_s11 + $0x18] sm:$0xff]  }
 0x538   : > { %1561 = vmatprep.mubr.msk.bf16.mxu0 %vm1928_vm1, %v1927_v8 }
 0x54b   : > { %v877_v31 = vpop.xlane.xlu1 %876 }
 0x54c   : > { %1725 = vrcp.f32 %v877_v31  ;;  %v1477_v31 = vld [vmem:[%s2382_s10] ss:$0 sm:$0xff] }
 0x54d   : > { %1727 = vrcp.f32 %v993_v26 }
 0x54f   : > { %v882_v32 = vpop.permute.xlu1 %881 }
 0x550   : > { %v887_v33 = vsel %vm657_vm3, %v882_v32, 0 }
 0x551   : > { %1560 = vmatpush3.bf16.msra.mxu0 %v887_v33 }
 0x552   : > { %1571 = vmatprep.subr.bf16.mxu0 %v1927_v8 }
 0x553   : > { %v998_v36 = vpop.permute.xlu1 %997 }
 0x554   : > { %v1003_v39 = vsel %vm657_vm3, %v998_v36, 0 }
 0x556   : > { %v1726_v34 = vpop.eup %1725 }
 0x557   : > { %v879_v35 = vmul.f32 %v1726_v34, %v1720_v16  ;;  %v1728_v38 = vpop.eup %1727  ;;  %v1705_v16 = vld [vmem:[%s2381_s9] sm:$0xff]  }
 0x558   : > { %v995_v40 = vmul.f32 %v1728_v38, %v1718_v11 }
 0x559   : > { %v880_v37 = vpack.c.bf16 %v879_v35, %v879_v35 }
 0x55a   : > { %v996_v41 = vpack.c.bf16 %v995_v40, %v995_v40 }
 0x55b   : > { %1562 = vmatmul.mubr.msk.bf16.vlgmr.msra.gmra.mrb[12].mxu0 %vm593_vm2, %v880_v37 }
 0x55c   : > { %1572 = vmatpush3.bf16.msra.mxu0 %v1003_v39  ;;  %1573 = vmatprep.mubr.msk.bf16.mxu0 %vm1928_vm1, %v1927_v8 }
 0x55d   : > { %1585 = vmatprep.subr.bf16.mxu0 %v1927_v8 }
 0x563   : > { %1574 = vmatmul.mubr.msk.bf16.vlgmr.msra.gmra.mrb[16].mxu0 %vm593_vm2, %v996_v41 }
 0x564   : > { %1589 = vmatprep.mubr.msk.bf16.mxu0 %vm1928_vm1, %v1927_v8  ;;  %1586 = vmatpush3.bf16.msra.mxu0 %v1705_v16 }
 0x565   : > { %1587 = vmatprep.subr.bf16.mxu0 %v1927_v8 }
 0x5f9   : > { %v695_v42 = vpop.f32.mrb[4].mxu0 }
 0x5fa   : > { %701 = vst.msk [vmem:[#allocation2] sm:$0xff] %vm593_vm2, %v695_v42  ;;  %v1539_v43 = vpop.f32.mrb[5].mxu0 }
 0x5fb   : > { %v698_v44 = vpop.f32.mrb[6].mxu0 }
 0x5fc   : > { %v1540_v45 = vpop.f32.mrb[7].mxu0 }
 0x60a   : > { %v807_v46 = vpop.f32.mrb[8].mxu0 }
 0x60b   : > { %814 = vrot.lane.b32.xlu0 %v807_v46, %s1940_s14  ;;  %v1551_v47 = vpop.f32.mrb[9].mxu0 }
 0x60c   : > { %v810_v48 = vpop.f32.mrb[10].mxu0 }
 0x60d   : > { %v1552_v49 = vpop.f32.mrb[11].mxu0 }
 0x62e   : > { %v923_v52 = vpop.f32.mrb[12].mxu0 }
 0x62f   : > { %930 = vrot.lane.b32.xlu1 %v923_v52, %s1941_s28  ;;  %v1563_v53 = vpop.f32.mrb[13].mxu0  ;;  %s1943_s28 = smov [#allocation11]  }
 0x630   : > { %v926_v54 = vpop.f32.mrb[14].mxu0 }
 0x631   : > { %v1564_v55 = vpop.f32.mrb[15].mxu0 }
 0x636   : > { %v1039_v56 = vpop.f32.mrb[16].mxu0 }
 0x637   : > { %1046 = vrot.lane.b32.xlu0 %v1039_v56, %s1942_s17  ;;  %v1575_v57 = vpop.f32.mrb[17].mxu0  ;;  %s1851_s17 = sshll.u32 %s1943_s28, 4  ;;  %s1852_s17 = int_to_ptr.vmem [resolvable:$false] %s1851_s17 }
 0x638   : > { %v1042_v58 = vpop.f32.mrb[18].mxu0  ;;  %s1853_s19 = scalar_lea.vmem %s1852_s17, 256  ;;  %p1854_p8 = scmp.lt.s32.totalorder %s2331_s27, %s1852_s17 }
 0x639   : > { %v1576_v59 = vpop.f32.mrb[19].mxu0  ;;  %p1855_p11 = scmp.lt.s32.totalorder %s1853_s19, %s1847_s16 }
 0x63b   : > { %p1856_p13 = por %p1855_p11, %p1854_p8 }
 0x63d   : > { %p1857_p1 = pnand %p1856_p13, %p1850_p7 }
 0x67d   : > { %v815_v60 = vpop.permute.xlu0 %814 }
 0x67e   : > { %818 = vst.msk [vmem:[#allocation2] sm:$0xff] %vm817_vm4, %v815_v60 }
 0x6a1   : > { %v931_v61 = vpop.permute.xlu1 %930 }
 0x6a2   : > { %934 = vst.msk [vmem:[#allocation2] sm:$0xff] %vm933_vm5, %v931_v61 }
 0x6a9   : > { %v1047_v62 = vpop.permute.xlu0 %1046 }
 0x6aa   : > { %1050 = vst.msk [vmem:[#allocation2] sm:$0xff] %vm1049_vm6, %v1047_v62  ;;  %v1481_v62 = vld [vmem:[%s2384_s12] ss:$0 sm:$0xff] }
 0x6b1   : > { %v1051_v63 = vld [vmem:[#allocation2] sm:$0xff] }
 0x6b2   : > { %v1052_v1 = vpack.c.bf16 %v1051_v63, %v1051_v63 }
 0x6b4   : > { %1582 = vmatmul.mubr.msk.bf16.vlgmr.msra.gmra.mrb[16].mxu1 %vm491_vm0, %v1052_v1 }
 0x6b5   : > { %1601 = vmatprep.mubr.msk.bf16.mxu1 %vm1928_vm1, %v1927_v8  ;;  %1594 = vmatpush3.bf16.msra.mxu1 %v1707_v27 }
 0x6b6   : > { %1595 = vmatprep.subr.bf16.mxu1 %v1927_v8 }
 0x6b9   : > { %1596 = vmatpush3.bf16.msra.mxu1 %v1708_v28 }
 0x6ba   : > { %1597 = vmatprep.subr.bf16.mxu1 %v1927_v8 }
 0x6bd   : > { %1598 = vmatpush3.bf16.msra.mxu1 %v1709_v29 }
 0x6be   : > { %1599 = vmatprep.subr.bf16.mxu1 %v1927_v8 }
 0x6c1   : > { %1600 = vmatpush3.bf16.msra.mxu1 %v1710_v30 }
 0x787   : > { %v1113_v3 = vpop.f32.mrb[16].mxu1 }
 0x788   : > { %v1114_v4 = vadd.f32 %v1471_v2, %v1113_v3  ;;  %v1583_v5 = vpop.f32.mrb[17].mxu1 }
 0x789   : > { %v1116_v6 = vpop.f32.mrb[18].mxu1 }
 0x78a   : > { %v2288_v7 = vadd.f32 %v1114_v4, %v2188_v0  ;;  %v1584_v9 = vpop.f32.mrb[19].mxu1  ;;  %v1706_v0 = vld [vmem:[%s2381_s9 + $0x8] sm:$0xff]  }
 0x78b   : > { %1588 = vmatpush3.bf16.msra.mxu0 %v1706_v0 }
 0x78c   : > { %v1122_v10 = vsel %vm491_vm0, %v2288_v7, 0.0 }
 0x78d   : > { %1123 = vadd.xlane.f32.xlu1 %v1122_v10 }
 0x81a   : > { %v1124_v11 = vpop.xlane.xlu1 %1123 }
 0x81b   : > { %v1125_v12 = vmul.f32 0.03125, %v1124_v11 }
 0x81d   : > { %v1126_v13 = vsub.f32 %v2288_v7, %v1125_v12 }
 0x81f   : > { %v1127_v14 = vmul.f32 %v1126_v13, %v1126_v13 }
 0x821   : > { %v1128_v15 = vsel %vm491_vm0, %v1127_v14, 0.0 }
 0x822   : > { %1129 = vadd.xlane.f32.xlu0 %v1128_v15 }
 0x8af   : > { %v1130_v17 = vpop.xlane.xlu0 %1129 }
 0x8b0   : > { %v1131_v18 = vmul.f32 0.03125, %v1130_v17 }
 0x8b2   : > { %v1132_v19 = vadd.f32 1e-05, %v1131_v18 }
 0x8b4   : > { %1729 = vrsqrt.f32 %v1132_v19 }
 0x8be   : > { %v1730_v20 = vpop.eup %1729 }
 0x8bf   : > { %v1134_v22 = vmul.f32 %v1730_v20, %v1126_v13 }
 0x8c1   : > { %v1141_v24 = vmul.f32 %v1475_v21, %v1134_v22 }
 0x8c3   : > { %v1148_v25 = vadd.f32 %v1476_v23, %v1141_v24 }
 0x8c5   : > { %v1149_v26 = vpack.c.bf16 %v1148_v25, %v1148_v25 }
 0x8c7   : > { %1590 = vmatmul.mubr.msk.bf16.vlgmr.msra.gmra.mrb[20].mxu0 %vm491_vm0, %v1149_v26 }
 0x99a   : > { %v1210_v32 = vpop.f32.mrb[20].mxu0 }
 0x99b   : > { %v1211_v33 = vadd.f32 %v1477_v31, %v1210_v32  ;;  %v1591_v34 = vpop.f32.mrb[21].mxu0 }
 0x99c   : > { %v1213_v35 = vpop.f32.mrb[22].mxu0 }
 0x99d   : > { %v1217_v36 = vmul.f32 0.70710677, %v1211_v33  ;;  %v1592_v37 = vpop.f32.mrb[23].mxu0  ;;  %v1216_v58 = vmul.f32 0.5, %v1211_v33 }
 0x99f   : > { %v1218_v38 = vand.u32 2147483647, %v1217_v36  ;;  %vm1238_vm7 = vcmp.ge.f32.partialorder %v1217_v36, 0.0 }
 0x9a1   : > { %v1219_v39 = vmul.f32 0.3275911, %v1218_v38  ;;  %v1232_v8 = vsub.f32 0.0, %v1218_v38 }
 0x9a3   : > { %v1220_v40 = vadd.f32 1.0, %v1219_v39  ;;  %v1233_v42 = vmul.f32 %v1232_v8, %v1218_v38 }
 0x9a5   : > { %1731 = vrcp.f32 %v1220_v40  ;;  %v1234_v45 = vmul.f32 1.442695, %v1233_v42 }
 0x9a7   : > { %1733 = vpow2.f32 %v1234_v45 }
 0x9af   : > { %v1732_v41 = vpop.eup %1731 }
 0x9b0   : > { %v1223_v43 = vmul.f32 1.0614054, %v1732_v41 }
 0x9b1   : > { %v1734_v53 = vpop.eup %1733 }
 0x9b2   : > { %v1224_v44 = vadd.f32 -1.4531521, %v1223_v43 }
 0x9b4   : > { %v1225_v46 = vmul.f32 %v1732_v41, %v1224_v44 }
 0x9b6   : > { %v1226_v47 = vadd.f32 1.4214138, %v1225_v46 }
 0x9b8   : > { %v1227_v48 = vmul.f32 %v1732_v41, %v1226_v47 }
 0x9ba   : > { %v1228_v49 = vadd.f32 -0.28449672, %v1227_v48 }
 0x9bc   : > { %v1229_v50 = vmul.f32 %v1732_v41, %v1228_v49 }
 0x9be   : > { %v1230_v51 = vadd.f32 0.2548296, %v1229_v50 }
 0x9c0   : > { %v1231_v52 = vmul.f32 %v1732_v41, %v1230_v51 }
 0x9c2   : > { %v1236_v54 = vmul.f32 %v1734_v53, %v1231_v52 }
 0x9c4   : > { %v1237_v55 = vsub.f32 1.0, %v1236_v54 }
 0x9c6   : > { %v1239_v56 = vsub.f32 0.0, %v1237_v55 }
 0x9c8   : > { %v1240_v57 = vsel %vm1238_vm7, %v1237_v55, %v1239_v56 }
 0x9c9   : > { %v1241_v59 = vadd.f32 1.0, %v1240_v57 }
 0x9cb   : > { %v1242_v60 = vmul.f32 %v1241_v59, %v1216_v58 }
 0x9cd   : > { %v1243_v61 = vpack.c.bf16 %v1242_v60, %v1242_v60 }
 0x9cf   : > { %1602 = vmatmul.mubr.msk.bf16.vlgmr.msra.gmra.mrb[20].mxu1 %vm1283_vm8, %v1243_v61 }
 0xaa2   : > { %v1321_v63 = vpop.f32.mrb[20].mxu1 }
 0xaa3   : > { %v1322_v1 = vadd.f32 %v1481_v62, %v1321_v63  ;;  %v1603_v2 = vpop.f32.mrb[21].mxu1 }
 0xaa4   : > { %v1324_v3 = vpop.f32.mrb[22].mxu1 }
 0xaa5   : > { %v1327_v4 = vadd.f32 %v1322_v1, %v2288_v7  ;;  %v1604_v5 = vpop.f32.mrb[23].mxu1 }
 0xaa7   : > { %1328 = vst.msk [vmem:[%s482_s15] sm:$0xff] %vm491_vm0, %v1327_v4 }
 0xaa8   : > { %1860 = shalt.err (!%p1857_p1)
}
 0xaa9   : > { %s1861_s20 = scalar_lea.hbm %s2329_s13, 128  ;;  %s1865_s25 = scalar_lea.hbm %s2415_s24, 256 }
 0xaaa   : > { %p1862_p0 = scmp.ne.s32.totalorder %s2329_s13, %s1861_s20  ;;  %p1866_p9 = scmp.lt.u32.totalorder %s2329_s13, %s2415_s24 }
 0xaab   : > { %p1867_p12 = scmp.lt.u32.totalorder %s1865_s25, %s1861_s20  ;;  %p1869_p2 = scmp.lt.u32.totalorder %s1861_s20, %s2329_s13 }
 0xaac   : > { %p1863_p6 = pnand %p1862_p0, %p2416_p3 }
 0xaad   : > { %p1868_p10 = por %p1867_p12, %p1866_p9 }
 0xaae   : > { %p1864_p5 = pneg %p1863_p6 }
 0xaaf   : > { %p1870_p4 = por %p1869_p2, %p1868_p10 }
 0xab1   : > { %p1871_p7 = pnand %p1870_p4, %p1864_p5 }
 0xab3   : > { %1874 = shalt.err (!%p1871_p7)
}
 0xab4   : > { %1621 = dma.vmem_to_hbm [thread:$0]  (%p2416_p3), %s2331_s27, 128, %s2329_s13, %s1330_s29  }
 0xab5 PF: > { %s2417_s14 = sld [smem:[#allocation18_spill]]  ;;  %s2418_s22 = sld [smem:[#allocation16_spill]] }
 0xab6   : > { %s2419_s16 = sld [smem:[#allocation21_spill]] }
 0xabb   : > { %p1648_p8 = scmp.ge.s32.totalorder %s2417_s14, 2  ;;  %s1355_s28 = sand.u32 1, %s2418_s22  }
 0xabc   : > { %p2420_p11 = scmp.ne.s32.totalorder %s2419_s16, 0  ;;  %s1356_s17 = scalar_lea.sflag [#allocation5], %s1355_s28 }
 0xabe   : > { %p1637_p13 = pnand %p1648_p8, %p2420_p11 }
 0xac0   : > { %1904 = dma.done.wait (!%p1637_p13), %s1356_s17, 128  }
 0xac1   : > { %1906 = vsyncadd (!%p1637_p13), %s1356_s17, 4294967168  ;;  %s2421_s28 = sld [smem:[#allocation19_spill]]  ;;  %s2422_s19 = sld [smem:[#allocation17_spill]] }
 0xac2   : > { %s2423_s27 = sld [smem:[#allocation20_spill]]  ;;  %s2424_s25 = smov %s1913_s26 }
 0xac7   : > { %p26_p1 = scmp.ge.s32.totalorder %s2421_s28, 4   ;;  %s2425_s26 = smov %s2422_s19 }
 0xac9   :  { %28 = sbr.rel (!%p26_p1) target bundleno = 8 (0x8), region = 124 }
 0xad0   :  { %1361 = vsyncpa [#allocation4], 1 }
 0xad1   :  { %1363 = vsyncpa [#allocation4 + $0x1], 1 }
 0xad2   :  { %1364 = vsyncpa [#allocation7], 1 }
 0xad3   :  { %1365 = vsyncpa [#allocation10], 1 }
 0xad4   :  { %1366 = vsyncpa [#allocation5], 1 }
 0xad5   :  { %1368 = vsyncpa [#allocation5 + $0x1], 1 }

// kernel: tpu_custom_call.1
= control target key start
LH: loop header
LB: loop body
LE: loop exit
PB: predicated region body
PF: predicated region fallthrough
CT: control target
= control target key end

     0   :  { %s2372_s0 = inlined_call_operand.vmem [shape: f32[2,8,32], index: 0, kind: input, shape index: {}]   ;;  %s2373_s1 = inlined_call_operand.vmem [shape: bf16[32,96], index: 1, kind: input, shape index: {}]   ;;  %s2374_s2 = inlined_call_operand.vmem [shape: f32[1,96], index: 2, kind: input, shape index: {}]   ;;  %s2375_s3 = inlined_call_operand.vmem [shape: bf16[32,32], index: 3, kind: input, shape index: {}]   ;;  %s2376_s4 = inlined_call_operand.vmem [shape: f32[1,32], index: 4, kind: input, shape index: {}]   ;;  %s2377_s5 = inlined_call_operand.hbm [shape: f32[1,32], index: 5, kind: input, shape index: {}]   ;;  %s2378_s6 = inlined_call_operand.hbm [shape: f32[1,32], index: 6, kind: input, shape index: {}]   ;;  %s2379_s7 = inlined_call_operand.hbm [shape: f32[1,32], index: 7, kind: input, shape index: {}]   ;;  %s2380_s8 = inlined_call_operand.hbm [shape: f32[1,32], index: 8, kind: input, shape index: {}]   ;;  %s2381_s9 = inlined_call_operand.vmem [shape: bf16[32,64], index: 9, kind: input, shape index: {}]   ;;  %s2382_s10 = inlined_call_operand.vmem [shape: f32[1,64], index: 10, kind: input, shape index: {}]   ;;  %s2383_s11 = inlined_call_operand.vmem [shape: bf16[64,32], index: 11, kind: input, shape index: {}]   ;;  %s2384_s12 = inlined_call_operand.vmem [shape: f32[1,32], index: 12, kind: input, shape index: {}]   ;;  %s2385_s13 = inlined_call_operand.hbm [shape: f32[2,8,32], index: 13, kind: output, shape index: {}]  }
   0x1   :  { %2396 = sst [smem:[#allocation22_spill]] %s2385_s13 }
   0x2   :  { %18 = vsyncpa [#allocation4], 0 }
   0x3   :  { %19 = vsyncpa [#allocation7], 0 }
   0x4   :  { %20 = vsyncpa [#allocation10], 0 }
   0x5   :  { %21 = vsyncpa [#allocation5], 0 }
   0x6   :  { %23 = vsyncpa [#allocation5 + $0x1], 0  ;;  %s2014_s25 = smov 0   ;;  %s2016_s26 = smov 0  }
   0x7   :  { %s2018_s27 = smov 0   ;;  %s2020_s28 = smov 0  }
   0x8 LB: > { %2397 = sst [smem:[#allocation16_spill]] %s1909_s25  ;;  %s2035_s29 = sadd.s32 4294967295, %s1921_s28   ;;  %s1921_s28 = sphi %s2020_s28, %s2421_s28   ;;  %s1917_s27 = sphi %s2018_s27, %s2423_s27   ;;  %s1913_s26 = sphi %s2016_s26, %s2425_s26   ;;  %s1909_s25 = sphi %s2014_s25, %s2424_s25  }
   0x9   : > { %2398 = sst [smem:[#allocation17_spill]] %s1917_s27  ;;  %s1443_s30 = sadd.s32 4294967294, %s1921_s28  }
   0xa   : > { %2399 = sst [smem:[#allocation18_spill]] %s1921_s28  ;;  %s2039_s14 = sadd.s32 1, %s1921_s28  }
   0xb   : > { %2400 = sst [smem:[#allocation19_spill]] %s2039_s14  ;;  %s314_s15 = sadd.s32 1, %s1917_s27 }
   0xc   : > { %s311_s16 = ssub.s32 %s1921_s28, %s2039_s14  ;;  %p324_p0 = scmp.ne.s32.totalorder %s1917_s27, %s1913_s26 }
   0xd   : > { %p312_p1 = scmp.eq.s32.totalorder %s311_s16, 0  ;;  %p325_p2 = scmp.eq.s32.totalorder %s2035_s29, 1 }
   0xe   : > { %p330_p3 = scmp.ne.s32.totalorder %s1913_s26, %s1909_s25  ;;  %p331_p4 = scmp.eq.s32.totalorder %s1443_s30, 1 }
   0xf   : > { %s2050_s17 = scalar_select %p312_p1, %s1917_s27, %s314_s15  }
  0x10   : > { %p2052_p5 = por %p325_p2, %p324_p0  ;;  %p2056_p6 = por %p331_p4, %p330_p3 }
  0x11   : > { %2401 = sst [smem:[#allocation20_spill]] %s2050_s17  ;;  %p1444_p7 = scmp.ge.s32.totalorder %s1921_s28, 1 }
  0x12   : > { %s2402_s18 = scalar_select %p2052_p5, 1, 0 }
  0x13   : > { %s2403_s19 = scalar_select %p2056_p6, 1, 0 }
  0x14   : > { %p338_p8 = scmp.lt.s32.totalorder %s1921_s28, 3  ;;  %p2391_p9 = scmp.eq.s32.totalorder %s2035_s29, 0 }
  0x15   : > { %2404 = sst [smem:[#allocation21_spill]] %s2403_s19  ;;  %s1923_s21 = smov [#allocation6]  }
  0x16   : > { %p2063_p10 = pnand %p1444_p7, %p338_p8  ;;  %s374_s22 = sshll.u32 %s1923_s21, 4  ;;  %s375_s22 = int_to_ptr.vmem [resolvable:$true] %s374_s22 }
  0x17   : > { %s1924_s23 = smov [#allocation3]   ;;  %s1925_s15 = smov [#allocation8]  }
  0x18   : > { %s2405_s20 = scalar_select %p2063_p10, 1, 0 }
  0x19   : > { %p1623_p11 = pneg %p2063_p10  ;;  %s363_s24 = sshll.u32 %s1924_s23, 4  ;;  %s2075_s24 = int_to_ptr.vmem [resolvable:$true] %s363_s24 }
  0x1a   : > { %s385_s16 = sshll.u32 %s1925_s15, 4  ;;  %s1735_s21 = scalar_lea.hbm %s2378_s6, 16  ;;  %s2077_s16 = int_to_ptr.vmem [resolvable:$true] %s385_s16 }
  0x1b   : > { %p2071_p12 = pnand %p2391_p9, %p1623_p11  ;;  %p1736_p13 = scmp.ne.s32.totalorder %s2378_s6, %s1735_s21 }
  0x1c   : > { %p1742_p3 = scmp.lt.u32.totalorder %s1735_s21, %s2378_s6 }
  0x1d   : > { %p2087_p0 = pneg %p2071_p12 }
  0x1f   : > { %p1738_p1 = pnand %p2087_p0, %p1736_p13 }
  0x21   : > { %p1739_p2 = pneg %p1738_p1 }
  0x23   : > { %p1744_p4 = pnand %p1742_p3, %p1739_p2 }
  0x25   : > { %1747 = shalt.err (!%p1744_p4)
}
  0x26   : > { %s1748_s27 = scalar_lea.vmem %s375_s22, 16  ;;  %s1755_s14 = scalar_lea.vmem %s375_s22, 32 }
  0x27   : > { %p1749_p7 = scmp.ne.s32.totalorder %s375_s22, %s1748_s27  ;;  %p1756_p9 = scmp.lt.s32.totalorder %s375_s22, %s375_s22 }
  0x28   : > { %p1757_p6 = scmp.lt.s32.totalorder %s1755_s14, %s1748_s27 }
  0x29   : > { %p1751_p8 = pnand %p1749_p7, %p2087_p0 }
  0x2a   : > { %p1758_p5 = por %p1757_p6, %p1756_p9 }
  0x2b   : > { %p1752_p11 = pneg %p1751_p8 }
  0x2d   : > { %p1759_p10 = pnand %p1758_p5, %p1752_p11 }
  0x2f   : > { %1762 = shalt.err (!%p1759_p10)
}
  0x30   : > { %1629 = dma.hbm_to_vmem [thread:$0]  (!%p2071_p12), %s2378_s6, 16, %s375_s22, [#allocation7]  }
  0x31   : > { %s1763_s15 = scalar_lea.hbm %s2377_s5, 16 }
  0x32   : > { %p1764_p13 = scmp.ne.s32.totalorder %s2377_s5, %s1763_s15  ;;  %p1770_p5 = scmp.lt.u32.totalorder %s1763_s15, %s2377_s5 }
  0x34   : > { %p1766_p1 = pnand %p1764_p13, %p2087_p0 }
  0x36   : > { %p1767_p6 = pneg %p1766_p1 }
  0x38   : > { %p1772_p9 = pnand %p1770_p5, %p1767_p6 }
  0x3a   : > { %1775 = shalt.err (!%p1772_p9)
}
  0x3b   : > { %s1776_s22 = scalar_lea.vmem %s2075_s24, 16  ;;  %s1783_s13 = scalar_lea.vmem %s2075_s24, 32 }
  0x3c   : > { %p1777_p10 = scmp.ne.s32.totalorder %s2075_s24, %s1776_s22  ;;  %p1784_p4 = scmp.lt.s32.totalorder %s2075_s24, %s2075_s24 }
  0x3d   : > { %p1785_p7 = scmp.lt.s32.totalorder %s1783_s13, %s1776_s22 }
  0x3e   : > { %p1779_p2 = pnand %p1777_p10, %p2087_p0 }
  0x3f   : > { %p1786_p8 = por %p1785_p7, %p1784_p4 }
  0x40   : > { %p1780_p3 = pneg %p1779_p2 }
  0x42   : > { %p1787_p11 = pnand %p1786_p8, %p1780_p3 }
  0x44   : > { %1790 = shalt.err (!%p1787_p11)
}
  0x45   : > { %1626 = dma.hbm_to_vmem [thread:$0]  (!%p2071_p12), %s2377_s5, 16, %s2075_s24, [#allocation4]  }
  0x46   : > { %s1791_s21 = scalar_lea.hbm %s2379_s7, 16 }
  0x47   : > { %p1792_p13 = scmp.ne.s32.totalorder %s2379_s7, %s1791_s21  ;;  %p1798_p5 = scmp.lt.u32.totalorder %s1791_s21, %s2379_s7 }
  0x49   : > { %p1794_p1 = pnand %p1792_p13, %p2087_p0 }
  0x4b   : > { %p1795_p6 = pneg %p1794_p1 }
  0x4d   : > { %p1800_p9 = pnand %p1798_p5, %p1795_p6 }
  0x4f   : > { %1803 = shalt.err (!%p1800_p9)
}
  0x50   : > { %s1804_s24 = scalar_lea.vmem %s2077_s16, 16  ;;  %s1811_s13 = scalar_lea.vmem %s2077_s16, 32 }
  0x51   : > { %p1805_p10 = scmp.ne.s32.totalorder %s2077_s16, %s1804_s24  ;;  %p1812_p4 = scmp.lt.s32.totalorder %s2077_s16, %s2077_s16 }
  0x52   : > { %p1813_p7 = scmp.lt.s32.totalorder %s1811_s13, %s1804_s24 }
  0x53   : > { %p1807_p2 = pnand %p1805_p10, %p2087_p0 }
  0x54   : > { %p1814_p8 = por %p1813_p7, %p1812_p4 }
  0x55   : > { %p1808_p3 = pneg %p1807_p2 }
  0x57   : > { %p1815_p11 = pnand %p1814_p8, %p1808_p3 }
  0x59   : > { %1818 = shalt.err (!%p1815_p11)
}
  0x5a   : > { %1632 = dma.hbm_to_vmem [thread:$0]  (!%p2071_p12), %s2379_s7, 16, %s2077_s16, [#allocation7]  }
  0x5b   : > { %s1926_s19 = smov [#allocation9]   ;;  %s1819_s27 = scalar_lea.hbm %s2380_s8, 16 }
  0x5c   : > { %s396_s25 = sshll.u32 %s1926_s19, 4  ;;  %p1820_p13 = scmp.ne.s32.totalorder %s2380_s8, %s1819_s27  ;;  %s397_s25 = int_to_ptr.vmem [resolvable:$true] %s396_s25 }
  0x5d   : > { %p1826_p5 = scmp.lt.u32.totalorder %s1819_s27, %s2380_s8 }
  0x5e   : > { %p1822_p1 = pnand %p1820_p13, %p2087_p0 }
  0x60   : > { %p1823_p6 = pneg %p1822_p1 }
  0x62   : > { %p1828_p9 = pnand %p1826_p5, %p1823_p6 }
  0x64   : > { %1831 = shalt.err (!%p1828_p9)
}
  0x65   : > { %s1832_s16 = scalar_lea.vmem %s397_s25, 16  ;;  %s1839_s28 = scalar_lea.vmem %s397_s25, 32 }
  0x66   : > { %p1833_p10 = scmp.ne.s32.totalorder %s397_s25, %s1832_s16  ;;  %p1840_p4 = scmp.lt.s32.totalorder %s397_s25, %s397_s25 }
  0x67   : > { %p1841_p7 = scmp.lt.s32.totalorder %s1839_s28, %s1832_s16 }
  0x68   : > { %p1835_p2 = pnand %p1833_p10, %p2087_p0 }
  0x69   : > { %p1842_p8 = por %p1841_p7, %p1840_p4 }
  0x6a   : > { %p1836_p3 = pneg %p1835_p2 }
  0x6c   : > { %p1843_p11 = pnand %p1842_p8, %p1836_p3 }
  0x6e   : > { %1846 = shalt.err (!%p1843_p11)
}
  0x6f   : > { %1635 = dma.hbm_to_vmem [thread:$0]  (!%p2071_p12), %s2380_s8, 16, %s397_s25, [#allocation10]  }
  0x70   : > { %p2408_p13 = scmp.ne.s32.totalorder %s2405_s20, 0 }
  0x71   : > { %p2409_p1 = scmp.eq.s32.totalorder (!%p2408_p13), %s2035_s29, 0 }
  0x72   : > { %428 = sbr.rel (%p2408_p13) target bundleno = 2741 (0xab5), region = 72 }
  0x79   : > { %1892 = dma.done.wait (%p2409_p1), [#allocation4], 16   ;;  %p2410_p0 = pmov %p2409_p1 }
  0x7b   : > { %1894 = vsyncadd (%p2410_p0), [#allocation4], 4294967280  ;;  %p2411_p6 = pmov %p2410_p0 }
  0x7c   : > { %p2412_p5 = pmov %p2410_p0 }
  0x7d   : > { %1896 = dma.done.wait (%p2411_p6), [#allocation7], 32  }
  0x7e   : > { %1898 = vsyncadd (%p2412_p5), [#allocation7], 4294967264  ;;  %p2413_p9 = pmov %p2410_p0 }
  0x7f   : > { %p2414_p12 = pmov %p2410_p0 }
  0x80   : > { %1900 = dma.done.wait (%p2413_p9), [#allocation10], 16  }
  0x81   : > { %1902 = vsyncadd (%p2414_p12), [#allocation10], 4294967280  ;;  %p483_p10 = scmp.lt.s32.totalorder %s2035_s29, 1  ;;  %vm491_vm0 = vcmask 261120   ;;  %v1701_v7 = vld [vmem:[%s2373_s1] sm:$0xff]   ;;  %v1927_v8 = vmov 0.0  }
  0x82   : > { %1521 = vmatprep.subr.bf16.mxu0 %v1927_v8  ;;  %vm1928_vm1 = vmmov 0   ;;  %v1702_v9 = vld [vmem:[%s2373_s1 + $0x8] sm:$0xff]   ;;  %1529 = vmatprep.subr.bf16.mxu1 %v1927_v8  ;;  %v1459_v20 = vld [vmem:[%s2374_s2] ss:$0 sm:$0xff]  ;;  %s1929_s16 = smov 96   ;;  %s1930_s28 = smov 120  }
  0x83   : > { %s484_s20 = scalar_select %p483_p10, %s2035_s29, 1  ;;  %1525 = vmatprep.mubr.msk.bf16.mxu0 %vm1928_vm1, %v1927_v8  ;;  %1522 = vmatpush3.bf16.msra.mxu0 %v1701_v7  ;;  %v1457_v14 = vld [vmem:[#allocation3] ss:$0 sm:$0xff]  ;;  %v1458_v16 = vld [vmem:[#allocation6] ss:$0 sm:$0xff]  ;;  %vm593_vm2 = vcmask 64512  }
  0x84   : > { %1523 = vmatprep.subr.bf16.mxu0 %v1927_v8  ;;  %1531 = vmatprep.mubr.msk.bf16.mxu1 %vm1928_vm1, %v1927_v8  ;;  %s1931_s17 = smov 88   ;;  %s1932_s19 = smov 80   ;;  %vm657_vm3 = vcmask 1043456   ;;  %vm817_vm4 = vcmask 130112   ;;  %vm933_vm5 = vcmask 195712   ;;  %vm1049_vm6 = vcmask 261312  }
  0x85   : > { %s1456_s30 = sshll.u32 %s484_s20, 3  ;;  %s1933_s20 = smov 112   ;;  %vm1283_vm8 = vcmask 523264  }
  0x86   : > { %s486_s21 = scalar_lea.vmem %s2372_s0, %s1456_s30  ;;  %s1934_s30 = smov 72  }
  0x87   : > { %v2188_v0 = vld [vmem:[%s486_s21] sm:$0xff]  ;;  %1524 = vmatpush3.bf16.msra.mxu0 %v1702_v9  ;;  %s1935_s23 = smov 104   ;;  %s1936_s25 = smov 64  }
  0x88   : > { %v492_v1 = vsel %vm491_vm0, %v2188_v0, 0.0  ;;  %1535 = vmatprep.subr.bf16.mxu0 %v1927_v8  ;;  %s1937_s21 = smov 56   ;;  %s1938_s15 = smov 48  }
  0x89   : > { %493 = vadd.xlane.f32.xlu0 %v492_v1  ;;  %s1939_s27 = smov 40   ;;  %s1940_s14 = smov 8  }
  0x8a   : > { %s2415_s24 = sld [smem:[#allocation22_spill]]  ;;  %p2416_p3 = scmp.ne.s32.totalorder %s2402_s18, 0 }
 0x116   : > { %v494_v2 = vpop.xlane.xlu0 %493 }
 0x117   : > { %v496_v3 = vmul.f32 0.03125, %v494_v2 }
 0x119   : > { %v497_v4 = vsub.f32 %v2188_v0, %v496_v3 }
 0x11b   : > { %v498_v5 = vmul.f32 %v497_v4, %v497_v4 }
 0x11d   : > { %v499_v6 = vsel %vm491_vm0, %v498_v5, 0.0 }
 0x11e   : > { %500 = vadd.xlane.f32.xlu0 %v499_v6 }
 0x1ab   : > { %v501_v10 = vpop.xlane.xlu0 %500 }
 0x1ac   : > { %v502_v11 = vmul.f32 0.03125, %v501_v10 }
 0x1ae   : > { %v503_v12 = vadd.f32 1e-05, %v502_v11 }
 0x1b0   : > { %1711 = vrsqrt.f32 %v503_v12 }
 0x1ba   : > { %v1712_v13 = vpop.eup %1711 }
 0x1bb   : > { %v505_v15 = vmul.f32 %v1712_v13, %v497_v4 }
 0x1bd   : > { %v512_v17 = vmul.f32 %v1457_v14, %v505_v15 }
 0x1bf   : > { %v519_v18 = vadd.f32 %v1458_v16, %v512_v17 }
 0x1c1   : > { %v520_v19 = vpack.c.bf16 %v519_v18, %v519_v18 }
 0x1c3   : > { %1526 = vmatmul.mubr.msk.bf16.vlgmr.msra.gmra.mrb[0].mxu0 %vm491_vm0, %v520_v19 }
 0x1c4   : > { %1537 = vmatprep.mubr.msk.bf16.mxu0 %vm1928_vm1, %v1927_v8 }
 0x296   : > { %v581_v21 = vpop.f32.mrb[0].mxu0 }
 0x297   : > { %v582_v22 = vadd.f32 %v1459_v20, %v581_v21  ;;  %v1527_v23 = vpop.f32.mrb[1].mxu0 }
 0x298   : > { %v584_v24 = vpop.f32.mrb[2].mxu0 }
 0x299   : > { %v587_v25 = vmul.f32 0.35355338, %v582_v22  ;;  %v2214_v26 = vpack.c.bf16 %v582_v22, %v582_v22  ;;  %v1528_v27 = vpop.f32.mrb[3].mxu0 }
 0x29b   : > { %v588_v28 = vpack.c.bf16 %v587_v25, %v587_v25  ;;  %591 = vrot.lane.b32.xlu1 %v2214_v26, %s1929_s16 }
 0x29d   : > { %703 = vrot.lane.b32.xlu0 %v588_v28, %s1930_s28  ;;  %s1941_s28 = smov 16  }
 0x29f   : > { %705 = vrot.lane.b32.xlu1 %v2214_v26, %s1931_s17  ;;  %s1942_s17 = smov 24  }
 0x2a3   : > { %821 = vrot.lane.b32.xlu1 %v2214_v26, %s1932_s19 }
 0x2a7   : > { %819 = vrot.lane.b32.xlu1 %v588_v28, %s1933_s20  ;;  %s480_s20 = sand.u32 1, %s1913_s26  }
 0x2ab   : > { %937 = vrot.lane.b32.xlu1 %v2214_v26, %s1934_s30  ;;  %s1455_s30 = sshll.u32 %s480_s20, 3 }
 0x2af   : > { %935 = vrot.lane.b32.xlu1 %v588_v28, %s1935_s23 }
 0x30d   : > { %v592_v29 = vpop.permute.xlu1 %591 }
 0x30e   : > { %v598_v30 = vsel %vm593_vm2, %v592_v29, 0 }
 0x30f   : > { %1530 = vmatpush3.bf16.xpose.msra.mxu1 %v598_v30  ;;  %v704_v34 = vpop.permute.xlu0 %703 }
 0x310   : > { %1541 = vmatprep.subr.bf16.mxu1 %v1927_v8 }
 0x311   : > { %v706_v31 = vpop.permute.xlu1 %705 }
 0x312   : > { %v711_v32 = vsel %vm593_vm2, %v706_v31, 0 }
 0x315   : > { %v822_v33 = vpop.permute.xlu1 %821 }
 0x316   : > { %1532 = vmatmul.mubr.msk.bf16.vlgmr.msra.gmra.mrb[0].mxu1 %vm593_vm2, %v588_v28  ;;  %v827_v36 = vsel %vm593_vm2, %v822_v33, 0 }
 0x317   : > { %1542 = vmatpush3.bf16.xpose.msra.mxu1 %v711_v32  ;;  %1543 = vmatprep.mubr.msk.bf16.mxu1 %vm1928_vm1, %v1927_v8 }
 0x318   : > { %1553 = vmatprep.subr.bf16.mxu1 %v1927_v8 }
 0x319   : > { %v820_v35 = vpop.permute.xlu1 %819 }
 0x31d   : > { %v938_v37 = vpop.permute.xlu1 %937 }
 0x31e   : > { %1544 = vmatmul.mubr.msk.bf16.vlgmr.msra.gmra.mrb[4].mxu1 %vm593_vm2, %v704_v34  ;;  %v943_v38 = vsel %vm593_vm2, %v938_v37, 0 }
 0x31f   : > { %1554 = vmatpush3.bf16.xpose.msra.mxu1 %v827_v36  ;;  %1555 = vmatprep.mubr.msk.bf16.mxu1 %vm1928_vm1, %v1927_v8 }
 0x320   : > { %1565 = vmatprep.subr.bf16.mxu1 %v1927_v8 }
 0x321   : > { %v936_v39 = vpop.permute.xlu1 %935 }
 0x326   : > { %1556 = vmatmul.mubr.msk.bf16.vlgmr.msra.gmra.mrb[8].mxu1 %vm593_vm2, %v820_v35 }
 0x327   : > { %1566 = vmatpush3.bf16.xpose.msra.mxu1 %v943_v38  ;;  %1567 = vmatprep.mubr.msk.bf16.mxu1 %vm1928_vm1, %v1927_v8 }
 0x328   : > { %1577 = vmatprep.subr.bf16.mxu1 %v1927_v8 }
 0x32e   : > { %1568 = vmatmul.mubr.msk.bf16.vlgmr.msra.gmra.mrb[12].mxu1 %vm593_vm2, %v936_v39 }
 0x32f   : > { %1581 = vmatprep.mubr.msk.bf16.mxu1 %vm1928_vm1, %v1927_v8 }
 0x3e9   : > { %v634_v40 = vpop.f32.mrb[0].mxu1 }
 0x3ea   : > { %v1533_v41 = vpop.f32.mrb[1].mxu1  ;;  %v640_v42 = vsel %vm593_vm2, %v634_v40, -inf }
 0x3eb   : > { %641 = vmax.xlane.f32.xlu1 %v640_v42  ;;  %v637_v43 = vpop.f32.mrb[2].mxu1 }
 0x3ec   : > { %v1534_v44 = vpop.f32.mrb[3].mxu1 }
 0x3f1   : > { %v747_v45 = vpop.f32.mrb[4].mxu1 }
 0x3f2   : > { %v1545_v46 = vpop.f32.mrb[5].mxu1  ;;  %v753_v47 = vsel %vm593_vm2, %v747_v45, -inf }
 0x3f3   : > { %754 = vmax.xlane.f32.xlu0 %v753_v47  ;;  %v750_v48 = vpop.f32.mrb[6].mxu1 }
 0x3f4   : > { %v1546_v49 = vpop.f32.mrb[7].mxu1 }
 0x3f9   : > { %v863_v50 = vpop.f32.mrb[8].mxu1 }
 0x3fa   : > { %v1557_v51 = vpop.f32.mrb[9].mxu1  ;;  %v869_v52 = vsel %vm593_vm2, %v863_v50, -inf }
 0x3fb   : > { %870 = vmax.xlane.f32.xlu1 %v869_v52  ;;  %v866_v53 = vpop.f32.mrb[10].mxu1  ;;  %v1704_v51 = vld [vmem:[%s2375_s3 + $0x8] sm:$0xff]  }
 0x3fc   : > { %v1558_v54 = vpop.f32.mrb[11].mxu1 }
 0x401   : > { %v979_v55 = vpop.f32.mrb[12].mxu1 }
 0x402   : > { %v1569_v56 = vpop.f32.mrb[13].mxu1  ;;  %v985_v57 = vsel %vm593_vm2, %v979_v55, -inf }
 0x403   : > { %986 = vmax.xlane.f32.xlu0 %v985_v57  ;;  %v982_v58 = vpop.f32.mrb[14].mxu1 }
 0x404   : > { %v1570_v59 = vpop.f32.mrb[15].mxu1 }
 0x478   : > { %v642_v60 = vpop.xlane.xlu1 %641 }
 0x479   : > { %v643_v61 = vsub.f32 %v634_v40, %v642_v60 }
 0x47b   : > { %v644_v62 = vmul.f32 1.442695, %v643_v61 }
 0x47d   : > { %1713 = vpow2.f32 %v644_v62 }
 0x480   : > { %v755_v63 = vpop.xlane.xlu0 %754 }
 0x481   : > { %v756_v1 = vsub.f32 %v747_v45, %v755_v63 }
 0x483   : > { %v757_v2 = vmul.f32 1.442695, %v756_v1 }
 0x485   : > { %1715 = vpow2.f32 %v757_v2  ;;  %v1471_v2 = vld [vmem:[%s2376_s4] ss:$0 sm:$0xff] }
 0x487   : > { %v1714_v3 = vpop.eup %1713 }
 0x488   : > { %v646_v4 = vsel %vm593_vm2, %v1714_v3, 0.0  ;;  %v871_v13 = vpop.xlane.xlu1 %870 }
 0x489   : > { %647 = vadd.xlane.f32.xlu1 %v646_v4  ;;  %v872_v14 = vsub.f32 %v863_v50, %v871_v13  ;;  %v1703_v50 = vld [vmem:[%s2375_s3] sm:$0xff]  }
 0x48a   : > { %1578 = vmatpush3.bf16.msra.mxu1 %v1703_v50 }
 0x48b   : > { %v873_v15 = vmul.f32 1.442695, %v872_v14  ;;  %1579 = vmatprep.subr.bf16.mxu1 %v1927_v8 }
 0x48e   : > { %1580 = vmatpush3.bf16.msra.mxu1 %v1704_v51 }
 0x48f   : > { %v1716_v5 = vpop.eup %1715  ;;  %1593 = vmatprep.subr.bf16.mxu1 %v1927_v8 }
 0x490   : > { %v987_v6 = vpop.xlane.xlu0 %986  ;;  %v759_v7 = vsel %vm593_vm2, %v1716_v5, 0.0 }
 0x491   : > { %v988_v9 = vsub.f32 %v979_v55, %v987_v6  ;;  %760 = vadd.xlane.f32.xlu0 %v759_v7 }
 0x493   : > { %v989_v10 = vmul.f32 1.442695, %v988_v9 }
 0x495   : > { %1717 = vpow2.f32 %v989_v10 }
 0x496   : > { %1719 = vpow2.f32 %v873_v15 }
 0x49a   : > { %652 = vrot.lane.b32.xlu1 %v2214_v26, %s1936_s25 }
 0x49f   : > { %v1718_v11 = vpop.eup %1717 }
 0x4a0   : > { %v991_v12 = vsel %vm593_vm2, %v1718_v11, 0.0  ;;  %v1720_v16 = vpop.eup %1719 }
 0x4a1   : > { %992 = vadd.xlane.f32.xlu0 %v991_v12  ;;  %v875_v17 = vsel %vm593_vm2, %v1720_v16, 0.0 }
 0x4b7   : > { %765 = vrot.lane.b32.xlu0 %v2214_v26, %s1937_s21  ;;  %s1488_s21 = sshll.u32 %s2035_s29, 7  ;;  %s1330_s29 = scalar_lea.sflag [#allocation5], %s480_s20 }
 0x4b8   : > { %s2329_s13 = scalar_lea.hbm %s2415_s24, %s1488_s21 }
 0x4be   : > { %876 = vadd.xlane.f32.xlu1 %v875_v17 }
 0x4cf   : > { %881 = vrot.lane.b32.xlu1 %v2214_v26, %s1938_s15  ;;  %s482_s15 = scalar_lea.vmem [#allocation11], %s1455_s30 }
 0x4d3   : > { %997 = vrot.lane.b32.xlu1 %v2214_v26, %s1939_s27  ;;  %s1343_s27 = sshll.u32 %s482_s15, 4  ;;  %s2331_s27 = int_to_ptr.vmem [resolvable:$true] %s1343_s27 }
 0x4d4   : > { %s1847_s16 = scalar_lea.vmem %s2331_s27, 128 }
 0x4d5   : > { %p1848_p2 = scmp.ne.s32.totalorder %s2331_s27, %s1847_s16 }
 0x4d7   : > { %p1849_p4 = pnand %p1848_p2, %p2416_p3 }
 0x4d9   : > { %p1850_p7 = pneg %p1849_p4 }
 0x516   : > { %v648_v18 = vpop.xlane.xlu1 %647 }
 0x517   : > { %1721 = vrcp.f32 %v648_v18 }
 0x51a   : > { %v653_v19 = vpop.permute.xlu1 %652 }
 0x51b   : > { %v659_v20 = vsel %vm657_vm3, %v653_v19, 0 }
 0x51c   : > { %1536 = vmatpush3.bf16.msra.mxu0 %v659_v20 }
 0x51d   : > { %1547 = vmatprep.subr.bf16.mxu0 %v1927_v8 }
 0x51e   : > { %v761_v22 = vpop.xlane.xlu0 %760 }
 0x51f   : > { %1723 = vrcp.f32 %v761_v22 }
 0x521   : > { %v1722_v21 = vpop.eup %1721 }
 0x522   : > { %v650_v23 = vmul.f32 %v1722_v21, %v1714_v3  ;;  %v1475_v21 = vld [vmem:[#allocation8] ss:$0 sm:$0xff] }
 0x524   : > { %v651_v24 = vpack.c.bf16 %v650_v23, %v650_v23  ;;  %v1476_v23 = vld [vmem:[#allocation9] ss:$0 sm:$0xff] }
 0x526   : > { %1538 = vmatmul.mubr.msk.bf16.vlgmr.msra.gmra.mrb[4].mxu0 %vm593_vm2, %v651_v24 }
 0x527   : > { %1549 = vmatprep.mubr.msk.bf16.mxu0 %vm1928_vm1, %v1927_v8 }
 0x529   : > { %v1724_v25 = vpop.eup %1723 }
 0x52a   : > { %v763_v27 = vmul.f32 %v1724_v25, %v1716_v5 }
 0x52c   : > { %v764_v30 = vpack.c.bf16 %v763_v27, %v763_v27  ;;  %v1707_v27 = vld [vmem:[%s2383_s11] sm:$0xff]  }
 0x52e   : > { %v993_v26 = vpop.xlane.xlu0 %992 }
 0x532   : > { %v766_v28 = vpop.permute.xlu0 %765 }
 0x533   : > { %v771_v29 = vsel %vm657_vm3, %v766_v28, 0  ;;  %v1708_v28 = vld [vmem:[%s2383_s11 + $0x8] sm:$0xff]  }
 0x534   : > { %1548 = vmatpush3.bf16.msra.mxu0 %v771_v29  ;;  %v1709_v29 = vld [vmem:[%s2383_s11 + $0x10] sm:$0xff]  }
 0x535   : > { %1559 = vmatprep.subr.bf16.mxu0 %v1927_v8 }
 0x537   : > { %1550 = vmatmul.mubr.msk.bf16.vlgmr.msra.gmra.mrb[8].mxu0 %vm593_vm2, %v764_v30  ;;  %v1710_v30 = vld [vmem:[%s2383_s11 + $0x18] sm:$0xff]  }
 0x538   : > { %1561 = vmatprep.mubr.msk.bf16.mxu0 %vm1928_vm1, %v1927_v8 }
 0x54b   : > { %v877_v31 = vpop.xlane.xlu1 %876 }
 0x54c   : > { %1725 = vrcp.f32 %v877_v31  ;;  %v1477_v31 = vld [vmem:[%s2382_s10] ss:$0 sm:$0xff] }
 0x54d   : > { %1727 = vrcp.f32 %v993_v26 }
 0x54f   : > { %v882_v32 = vpop.permute.xlu1 %881 }
 0x550   : > { %v887_v33 = vsel %vm657_vm3, %v882_v32, 0 }
 0x551   : > { %1560 = vmatpush3.bf16.msra.mxu0 %v887_v33 }
 0x552   : > { %1571 = vmatprep.subr.bf16.mxu0 %v1927_v8 }
 0x553   : > { %v998_v36 = vpop.permute.xlu1 %997 }
 0x554   : > { %v1003_v39 = vsel %vm657_vm3, %v998_v36, 0 }
 0x556   : > { %v1726_v34 = vpop.eup %1725 }
 0x557   : > { %v879_v35 = vmul.f32 %v1726_v34, %v1720_v16  ;;  %v1728_v38 = vpop.eup %1727  ;;  %v1705_v16 = vld [vmem:[%s2381_s9] sm:$0xff]  }
 0x558   : > { %v995_v40 = vmul.f32 %v1728_v38, %v1718_v11 }
 0x559   : > { %v880_v37 = vpack.c.bf16 %v879_v35, %v879_v35 }
 0x55a   : > { %v996_v41 = vpack.c.bf16 %v995_v40, %v995_v40 }
 0x55b   : > { %1562 = vmatmul.mubr.msk.bf16.vlgmr.msra.gmra.mrb[12].mxu0 %vm593_vm2, %v880_v37 }
 0x55c   : > { %1572 = vmatpush3.bf16.msra.mxu0 %v1003_v39  ;;  %1573 = vmatprep.mubr.msk.bf16.mxu0 %vm1928_vm1, %v1927_v8 }
 0x55d   : > { %1585 = vmatprep.subr.bf16.mxu0 %v1927_v8 }
 0x563   : > { %1574 = vmatmul.mubr.msk.bf16.vlgmr.msra.gmra.mrb[16].mxu0 %vm593_vm2, %v996_v41 }
 0x564   : > { %1589 = vmatprep.mubr.msk.bf16.mxu0 %vm1928_vm1, %v1927_v8  ;;  %1586 = vmatpush3.bf16.msra.mxu0 %v1705_v16 }
 0x565   : > { %1587 = vmatprep.subr.bf16.mxu0 %v1927_v8 }
 0x5f9   : > { %v695_v42 = vpop.f32.mrb[4].mxu0 }
 0x5fa   : > { %701 = vst.msk [vmem:[#allocation2] sm:$0xff] %vm593_vm2, %v695_v42  ;;  %v1539_v43 = vpop.f32.mrb[5].mxu0 }
 0x5fb   : > { %v698_v44 = vpop.f32.mrb[6].mxu0 }
 0x5fc   : > { %v1540_v45 = vpop.f32.mrb[7].mxu0 }
 0x60a   : > { %v807_v46 = vpop.f32.mrb[8].mxu0 }
 0x60b   : > { %814 = vrot.lane.b32.xlu0 %v807_v46, %s1940_s14  ;;  %v1551_v47 = vpop.f32.mrb[9].mxu0 }
 0x60c   : > { %v810_v48 = vpop.f32.mrb[10].mxu0 }
 0x60d   : > { %v1552_v49 = vpop.f32.mrb[11].mxu0 }
 0x62e   : > { %v923_v52 = vpop.f32.mrb[12].mxu0 }
 0x62f   : > { %930 = vrot.lane.b32.xlu1 %v923_v52, %s1941_s28  ;;  %v1563_v53 = vpop.f32.mrb[13].mxu0  ;;  %s1943_s28 = smov [#allocation11]  }
 0x630   : > { %v926_v54 = vpop.f32.mrb[14].mxu0 }
 0x631   : > { %v1564_v55 = vpop.f32.mrb[15].mxu0 }
 0x636   : > { %v1039_v56 = vpop.f32.mrb[16].mxu0 }
 0x637   : > { %1046 = vrot.lane.b32.xlu0 %v1039_v56, %s1942_s17  ;;  %v1575_v57 = vpop.f32.mrb[17].mxu0  ;;  %s1851_s17 = sshll.u32 %s1943_s28, 4  ;;  %s1852_s17 = int_to_ptr.vmem [resolvable:$false] %s1851_s17 }
 0x638   : > { %v1042_v58 = vpop.f32.mrb[18].mxu0  ;;  %s1853_s19 = scalar_lea.vmem %s1852_s17, 256  ;;  %p1854_p8 = scmp.lt.s32.totalorder %s2331_s27, %s1852_s17 }
 0x639   : > { %v1576_v59 = vpop.f32.mrb[19].mxu0  ;;  %p1855_p11 = scmp.lt.s32.totalorder %s1853_s19, %s1847_s16 }
 0x63b   : > { %p1856_p13 = por %p1855_p11, %p1854_p8 }
 0x63d   : > { %p1857_p1 = pnand %p1856_p13, %p1850_p7 }
 0x67d   : > { %v815_v60 = vpop.permute.xlu0 %814 }
 0x67e   : > { %818 = vst.msk [vmem:[#allocation2] sm:$0xff] %vm817_vm4, %v815_v60 }
 0x6a1   : > { %v931_v61 = vpop.permute.xlu1 %930 }
 0x6a2   : > { %934 = vst.msk [vmem:[#allocation2] sm:$0xff] %vm933_vm5, %v931_v61 }
 0x6a9   : > { %v1047_v62 = vpop.permute.xlu0 %1046 }
 0x6aa   : > { %1050 = vst.msk [vmem:[#allocation2] sm:$0xff] %vm1049_vm6, %v1047_v62  ;;  %v1481_v62 = vld [vmem:[%s2384_s12] ss:$0 sm:$0xff] }
 0x6b1   : > { %v1051_v63 = vld [vmem:[#allocation2] sm:$0xff] }
 0x6b2   : > { %v1052_v1 = vpack.c.bf16 %v1051_v63, %v1051_v63 }
 0x6b4   : > { %1582 = vmatmul.mubr.msk.bf16.vlgmr.msra.gmra.mrb[16].mxu1 %vm491_vm0, %v1052_v1 }
 0x6b5   : > { %1601 = vmatprep.mubr.msk.bf16.mxu1 %vm1928_vm1, %v1927_v8  ;;  %1594 = vmatpush3.bf16.msra.mxu1 %v1707_v27 }
 0x6b6   : > { %1595 = vmatprep.subr.bf16.mxu1 %v1927_v8 }
 0x6b9   : > { %1596 = vmatpush3.bf16.msra.mxu1 %v1708_v28 }
 0x6ba   : > { %1597 = vmatprep.subr.bf16.mxu1 %v1927_v8 }
 0x6bd   : > { %1598 = vmatpush3.bf16.msra.mxu1 %v1709_v29 }
 0x6be   : > { %1599 = vmatprep.subr.bf16.mxu1 %v1927_v8 }
 0x6c1   : > { %1600 = vmatpush3.bf16.msra.mxu1 %v1710_v30 }
 0x787   : > { %v1113_v3 = vpop.f32.mrb[16].mxu1 }
 0x788   : > { %v1114_v4 = vadd.f32 %v1471_v2, %v1113_v3  ;;  %v1583_v5 = vpop.f32.mrb[17].mxu1 }
 0x789   : > { %v1116_v6 = vpop.f32.mrb[18].mxu1 }
 0x78a   : > { %v2288_v7 = vadd.f32 %v1114_v4, %v2188_v0  ;;  %v1584_v9 = vpop.f32.mrb[19].mxu1  ;;  %v1706_v0 = vld [vmem:[%s2381_s9 + $0x8] sm:$0xff]  }
 0x78b   : > { %1588 = vmatpush3.bf16.msra.mxu0 %v1706_v0 }
 0x78c   : > { %v1122_v10 = vsel %vm491_vm0, %v2288_v7, 0.0 }
 0x78d   : > { %1123 = vadd.xlane.f32.xlu1 %v1122_v10 }
 0x81a   : > { %v1124_v11 = vpop.xlane.xlu1 %1123 }
 0x81b   : > { %v1125_v12 = vmul.f32 0.03125, %v1124_v11 }
 0x81d   : > { %v1126_v13 = vsub.f32 %v2288_v7, %v1125_v12 }
 0x81f   : > { %v1127_v14 = vmul.f32 %v1126_v13, %v1126_v13 }
 0x821   : > { %v1128_v15 = vsel %vm491_vm0, %v1127_v14, 0.0 }
 0x822   : > { %1129 = vadd.xlane.f32.xlu0 %v1128_v15 }
 0x8af   : > { %v1130_v17 = vpop.xlane.xlu0 %1129 }
 0x8b0   : > { %v1131_v18 = vmul.f32 0.03125, %v1130_v17 }
 0x8b2   : > { %v1132_v19 = vadd.f32 1e-05, %v1131_v18 }
 0x8b4   : > { %1729 = vrsqrt.f32 %v1132_v19 }
 0x8be   : > { %v1730_v20 = vpop.eup %1729 }
 0x8bf   : > { %v1134_v22 = vmul.f32 %v1730_v20, %v1126_v13 }
 0x8c1   : > { %v1141_v24 = vmul.f32 %v1475_v21, %v1134_v22 }
 0x8c3   : > { %v1148_v25 = vadd.f32 %v1476_v23, %v1141_v24 }
 0x8c5   : > { %v1149_v26 = vpack.c.bf16 %v1148_v25, %v1148_v25 }
 0x8c7   : > { %1590 = vmatmul.mubr.msk.bf16.vlgmr.msra.gmra.mrb[20].mxu0 %vm491_vm0, %v1149_v26 }
 0x99a   : > { %v1210_v32 = vpop.f32.mrb[20].mxu0 }
 0x99b   : > { %v1211_v33 = vadd.f32 %v1477_v31, %v1210_v32  ;;  %v1591_v34 = vpop.f32.mrb[21].mxu0 }
 0x99c   : > { %v1213_v35 = vpop.f32.mrb[22].mxu0 }
 0x99d   : > { %v1217_v36 = vmul.f32 0.70710677, %v1211_v33  ;;  %v1592_v37 = vpop.f32.mrb[23].mxu0  ;;  %v1216_v58 = vmul.f32 0.5, %v1211_v33 }
 0x99f   : > { %v1218_v38 = vand.u32 2147483647, %v1217_v36  ;;  %vm1238_vm7 = vcmp.ge.f32.partialorder %v1217_v36, 0.0 }
 0x9a1   : > { %v1219_v39 = vmul.f32 0.3275911, %v1218_v38  ;;  %v1232_v8 = vsub.f32 0.0, %v1218_v38 }
 0x9a3   : > { %v1220_v40 = vadd.f32 1.0, %v1219_v39  ;;  %v1233_v42 = vmul.f32 %v1232_v8, %v1218_v38 }
 0x9a5   : > { %1731 = vrcp.f32 %v1220_v40  ;;  %v1234_v45 = vmul.f32 1.442695, %v1233_v42 }
 0x9a7   : > { %1733 = vpow2.f32 %v1234_v45 }
 0x9af   : > { %v1732_v41 = vpop.eup %1731 }
 0x9b0   : > { %v1223_v43 = vmul.f32 1.0614054, %v1732_v41 }
 0x9b1   : > { %v1734_v53 = vpop.eup %1733 }
 0x9b2   : > { %v1224_v44 = vadd.f32 -1.4531521, %v1223_v43 }
 0x9b4   : > { %v1225_v46 = vmul.f32 %v1732_v41, %v1224_v44 }
 0x9b6   : > { %v1226_v47 = vadd.f32 1.4214138, %v1225_v46 }
 0x9b8   : > { %v1227_v48 = vmul.f32 %v1732_v41, %v1226_v47 }
 0x9ba   : > { %v1228_v49 = vadd.f32 -0.28449672, %v1227_v48 }
 0x9bc   : > { %v1229_v50 = vmul.f32 %v1732_v41, %v1228_v49 }
 0x9be   : > { %v1230_v51 = vadd.f32 0.2548296, %v1229_v50 }
 0x9c0   : > { %v1231_v52 = vmul.f32 %v1732_v41, %v1230_v51 }
 0x9c2   : > { %v1236_v54 = vmul.f32 %v1734_v53, %v1231_v52 }
 0x9c4   : > { %v1237_v55 = vsub.f32 1.0, %v1236_v54 }
 0x9c6   : > { %v1239_v56 = vsub.f32 0.0, %v1237_v55 }
 0x9c8   : > { %v1240_v57 = vsel %vm1238_vm7, %v1237_v55, %v1239_v56 }
 0x9c9   : > { %v1241_v59 = vadd.f32 1.0, %v1240_v57 }
 0x9cb   : > { %v1242_v60 = vmul.f32 %v1241_v59, %v1216_v58 }
 0x9cd   : > { %v1243_v61 = vpack.c.bf16 %v1242_v60, %v1242_v60 }
 0x9cf   : > { %1602 = vmatmul.mubr.msk.bf16.vlgmr.msra.gmra.mrb[20].mxu1 %vm1283_vm8, %v1243_v61 }
 0xaa2   : > { %v1321_v63 = vpop.f32.mrb[20].mxu1 }
 0xaa3   : > { %v1322_v1 = vadd.f32 %v1481_v62, %v1321_v63  ;;  %v1603_v2 = vpop.f32.mrb[21].mxu1 }
 0xaa4   : > { %v1324_v3 = vpop.f32.mrb[22].mxu1 }
 0xaa5   : > { %v1327_v4 = vadd.f32 %v1322_v1, %v2288_v7  ;;  %v1604_v5 = vpop.f32.mrb[23].mxu1 }
 0xaa7   : > { %1328 = vst.msk [vmem:[%s482_s15] sm:$0xff] %vm491_vm0, %v1327_v4 }
 0xaa8   : > { %1860 = shalt.err (!%p1857_p1)
}
 0xaa9   : > { %s1861_s20 = scalar_lea.hbm %s2329_s13, 128  ;;  %s1865_s25 = scalar_lea.hbm %s2415_s24, 256 }
 0xaaa   : > { %p1862_p0 = scmp.ne.s32.totalorder %s2329_s13, %s1861_s20  ;;  %p1866_p9 = scmp.lt.u32.totalorder %s2329_s13, %s2415_s24 }
 0xaab   : > { %p1867_p12 = scmp.lt.u32.totalorder %s1865_s25, %s1861_s20  ;;  %p1869_p2 = scmp.lt.u32.totalorder %s1861_s20, %s2329_s13 }
 0xaac   : > { %p1863_p6 = pnand %p1862_p0, %p2416_p3 }
 0xaad   : > { %p1868_p10 = por %p1867_p12, %p1866_p9 }
 0xaae   : > { %p1864_p5 = pneg %p1863_p6 }
 0xaaf   : > { %p1870_p4 = por %p1869_p2, %p1868_p10 }
 0xab1   : > { %p1871_p7 = pnand %p1870_p4, %p1864_p5 }
 0xab3   : > { %1874 = shalt.err (!%p1871_p7)
}
 0xab4   : > { %1621 = dma.vmem_to_hbm [thread:$0]  (%p2416_p3), %s2331_s27, 128, %s2329_s13, %s1330_s29  }
 0xab5 PF: > { %s2417_s14 = sld [smem:[#allocation18_spill]]  ;;  %s2418_s22 = sld [smem:[#allocation16_spill]] }
 0xab6   : > { %s2419_s16 = sld [smem:[#allocation21_spill]] }
 0xabb   : > { %p1648_p8 = scmp.ge.s32.totalorder %s2417_s14, 2  ;;  %s1355_s28 = sand.u32 1, %s2418_s22  }
 0xabc   : > { %p2420_p11 = scmp.ne.s32.totalorder %s2419_s16, 0  ;;  %s1356_s17 = scalar_lea.sflag [#allocation5], %s1355_s28 }
 0xabe   : > { %p1637_p13 = pnand %p1648_p8, %p2420_p11 }
 0xac0   : > { %1904 = dma.done.wait (!%p1637_p13), %s1356_s17, 128  }
 0xac1   : > { %1906 = vsyncadd (!%p1637_p13), %s1356_s17, 4294967168  ;;  %s2421_s28 = sld [smem:[#allocation19_spill]]  ;;  %s2422_s19 = sld [smem:[#allocation17_spill]] }
 0xac2   : > { %s2423_s27 = sld [smem:[#allocation20_spill]]  ;;  %s2424_s25 = smov %s1913_s26 }
 0xac7   : > { %p26_p1 = scmp.ge.s32.totalorder %s2421_s28, 4   ;;  %s2425_s26 = smov %s2422_s19 }
 0xac9   :  { %28 = sbr.rel (!%p26_p1) target bundleno = 8 (0x8), region = 124 }
 0xad0   :  { %1361 = vsyncpa [#allocation4], 1 }
 0xad1   :  { %1363 = vsyncpa [#allocation4 + $0x1], 1 }
 0xad2   :  { %1364 = vsyncpa [#allocation7], 1 }
 0xad3   :  { %1365 = vsyncpa [#allocation10], 1 }
 0xad4   :  { %1366 = vsyncpa [#allocation5], 1 }
 0xad5   :  { %1368 = vsyncpa [#allocation5 + $0x1], 1 }

</bundles_post_ra>
